<compile_context>
chip_gen: v7x
topology: tpu7x:2x2x1
jax: 0.10.0
libtpu: 0.0.40
codegen_flags: <defaults>
</compile_context>

<pallas_src>
import jax
import jax.numpy as jnp
from jax.experimental import pallas as pl
from jax.experimental.pallas import tpu as pltpu


# ----------------------------- Pallas kernels ------------------------------ #

def conv_pool_kernel(t_ref, w_ref, sc_ref, sh_ref, o_ref):
    """3x3 conv (as one matmul) + BN(eval) + ReLU + 2x2 MaxPool.

    t_ref : (M, 9*Cin)  bf16 im2col taps, rows grouped in 4s = one pool window
    w_ref : (9*Cin, Cout) bf16
    sc_ref, sh_ref : (1, Cout) f32 folded BN scale / shift
    o_ref : (M//4, Cout)
    """
    acc = jnp.dot(t_ref[...], w_ref[...], preferred_element_type=jnp.float32)
    y = jnp.maximum(acc * sc_ref[...] + sh_ref[...], 0.0)          # BN + ReLU
    M, C = y.shape
    # 2x2 maxpool: each group of 4 consecutive rows is one window (lane dim
    # untouched by the reshape, so this stays on the VPU/XLU, no MXU).
    o_ref[...] = jnp.max(y.reshape(M // 4, 4, C), axis=1).astype(o_ref.dtype)


def conv_pool_mlp_kernel(t_ref, w_ref, sc_ref, sh_ref,
                         w1_ref, b1_ref, w2_ref, b2_ref, o_ref):
    """Last conv block fused with the classifier head.

    Conv+BN+ReLU+MaxPool exactly as conv_pool_kernel, then
    Linear(flat,512) + ReLU + Linear(512,8), all in one kernel.
    """
    acc = jnp.dot(t_ref[...], w_ref[...], preferred_element_type=jnp.float32)
    y = jnp.maximum(acc * sc_ref[...] + sh_ref[...], 0.0)
    M, C = y.shape
    p = jnp.max(y.reshape(M // 4, 4, C), axis=1)                    # (B*S, C)
    B = o_ref.shape[0]
    S = (M // 4) // B
    if S == 1:
        flat = p                                                    # (B, C)
    else:
        # TODO(synk): only exercised for input_size > (16, 16); lane-merging
        # reshape inside the kernel, FC1 rows are pre-permuted to match order.
        flat = p.reshape(B, S * C)
    h = jnp.dot(flat.astype(jnp.bfloat16), w1_ref[...],
                preferred_element_type=jnp.float32) + b1_ref[...]
    h = jnp.maximum(h, 0.0)
    o = jnp.dot(h.astype(jnp.bfloat16), w2_ref[...],
                preferred_element_type=jnp.float32) + b2_ref[...]
    o_ref[...] = o.astype(o_ref.dtype)


# ------------------------------ JAX wrappers -------------------------------- #

def _fold_bn(p, eps=1e-5):
    scale = p["gamma"] / jnp.sqrt(p["var"] + eps)
    shift = p["beta"] - p["mean"] * scale + scale * p["b"]   # conv bias folded
    return scale, shift


def _build_pooled_taps(x):
    """x: (B,H,W,C) NHWC -> (B*H*W, 9*C) bf16 taps.

    Row order (b, ho, wo, dy, dx): every 4 consecutive rows are the 2x2
    maxpool window of one output pixel, window-major (b, ho, wo).
    """
    B, H, W, C = x.shape
    Ho, Wo = H // 2, W // 2
    xp = jnp.pad(x, ((0, 0), (1, 1), (1, 1), (0, 0)))
    taps = jnp.concatenate(
        [xp[:, dy:dy + H, dx:dx + W, :] for dy in range(3) for dx in range(3)],
        axis=-1)                                            # (B, H, W, 9C)
    taps = taps.reshape(B, Ho, 2, Wo, 2, 9 * C)
    taps = jnp.transpose(taps, (0, 1, 3, 2, 4, 5))          # (B,Ho,Wo,2,2,9C)
    return taps.reshape(B * H * W, 9 * C).astype(jnp.bfloat16)


def conv_block(x, p):
    """x: (B,H,W,Cin) NHWC -> (B,H//2,W//2,Cout) bf16."""
    B, H, W, Cin = x.shape
    Cout = p["w"].shape[-1]
    Ho, Wo = H // 2, W // 2
    scale, shift = _fold_bn(p)
    taps = _build_pooled_taps(x)
    wk = p["w"].reshape(9 * Cin, Cout).astype(jnp.bfloat16)

    out = pl.pallas_call(
        conv_pool_kernel,
        out_shape=jax.ShapeDtypeStruct((B * Ho * Wo, Cout), jnp.bfloat16),
        grid=(1,),
        in_specs=[
            pl.BlockSpec((B * H * W, 9 * Cin), lambda i: (0, 0)),
            pl.BlockSpec((9 * Cin, Cout), lambda i: (0, 0)),
            pl.BlockSpec((1, Cout), lambda i: (0, 0)),
            pl.BlockSpec((1, Cout), lambda i: (0, 0)),
        ],
        out_specs=pl.BlockSpec((B * Ho * Wo, Cout), lambda i: (0, 0)),
    )(taps, wk, scale.reshape(1, Cout), shift.reshape(1, Cout))
    return out.reshape(B, Ho, Wo, Cout)


def conv_head(x, p, fc_params):
    """Last conv block + fused classifier. x: (B,H,W,Cin) -> (B, 8) f32."""
    B, H, W, Cin = x.shape
    Cout = p["w"].shape[-1]
    Ho, Wo = H // 2, W // 2
    scale, shift = _fold_bn(p)
    taps = _build_pooled_taps(x)
    wk = p["w"].reshape(9 * Cin, Cout).astype(jnp.bfloat16)

    w1, b1, w2, b2 = fc_params
    Hd, O = w1.shape[1], w2.shape[1]
    # Permute FC1 rows from PyTorch NCHW-flatten order (c, ho, wo) to the
    # kernel's NHWC-flatten order (ho, wo, c). Identity when Ho = Wo = 1.
    w1p = (w1.reshape(Cout, Ho, Wo, Hd).transpose(1, 2, 0, 3)
             .reshape(Cout * Ho * Wo, Hd)).astype(jnp.bfloat16)

    return pl.pallas_call(
        conv_pool_mlp_kernel,
        out_shape=jax.ShapeDtypeStruct((B, O), jnp.float32),
        grid=(1,),
        in_specs=[
            pl.BlockSpec((B * H * W, 9 * Cin), lambda i: (0, 0)),
            pl.BlockSpec((9 * Cin, Cout), lambda i: (0, 0)),
            pl.BlockSpec((1, Cout), lambda i: (0, 0)),
            pl.BlockSpec((1, Cout), lambda i: (0, 0)),
            pl.BlockSpec((Cout * Ho * Wo, Hd), lambda i: (0, 0)),
            pl.BlockSpec((1, Hd), lambda i: (0, 0)),
            pl.BlockSpec((Hd, O), lambda i: (0, 0)),
            pl.BlockSpec((1, O), lambda i: (0, 0)),
        ],
        out_specs=pl.BlockSpec((B, O), lambda i: (0, 0)),
    )(taps, wk, scale.reshape(1, Cout), shift.reshape(1, Cout),
      w1p, b1.reshape(1, Hd), w2.astype(jnp.bfloat16), b2.reshape(1, O))


def grasp_cnn_forward(rgb, depth, conv_params, fc_params):
    """rgb: (B,3,H,W), depth: (B,1,H,W) (NCHW, like the PyTorch module)."""
    x = jnp.concatenate([rgb, depth], axis=1)   # (B, 4, H, W)
    x = jnp.transpose(x, (0, 2, 3, 1))          # -> NHWC
    for p in conv_params[:-1]:
        x = conv_block(x, p)
    out = conv_head(x, conv_params[-1], fc_params)
    return out.reshape(-1, 4, 2)


# ------------------------------ parameters ---------------------------------- #

def init_params(key, input_size=(16, 16)):
    layer_dims = [(4, 32), (32, 64), (64, 128), (128, 256)]
    conv_params = []
    for cin, cout in layer_dims:
        key, k1, k2, k3, k4, k5, k6 = jax.random.split(key, 7)
        conv_params.append(dict(
            w=jax.random.normal(k1, (3, 3, cin, cout), jnp.float32) * 0.05,
            b=jax.random.normal(k2, (cout,), jnp.float32) * 0.05,
            gamma=1.0 + 0.1 * jax.random.normal(k3, (cout,), jnp.float32),
            beta=0.1 * jax.random.normal(k4, (cout,), jnp.float32),
            mean=0.1 * jax.random.normal(k5, (cout,), jnp.float32),
            var=1.0 + 0.1 * jnp.abs(jax.random.normal(k6, (cout,), jnp.float32)),
        ))
    flat = 256 * (input_size[0] // 16) * (input_size[1] // 16)  # after 4 pools
    key, k1, k2, k3, k4 = jax.random.split(key, 5)
    fc_params = (
        jax.random.normal(k1, (flat, 512), jnp.float32) * 0.05,
        jax.random.normal(k2, (512,), jnp.float32) * 0.05,
        jax.random.normal(k3, (512, 8), jnp.float32) * 0.05,
        jax.random.normal(k4, (8,), jnp.float32) * 0.05,
    )
    return conv_params, fc_params


if __name__ == "__main__":
    key = jax.random.PRNGKey(0)
    kp, kr, kd = jax.random.split(key, 3)
    conv_params, fc_params = init_params(kp, input_size=(16, 16))
    rgb = jax.random.normal(kr, (2, 3, 16, 16), jnp.float32)
    depth = jax.random.normal(kd, (2, 1, 16, 16), jnp.float32)

    out = grasp_cnn_forward(rgb, depth, conv_params, fc_params)
    out = jax.block_until_ready(out)

    assert out.shape == (2, 4, 2), out.shape
    assert bool(jnp.all(jnp.isfinite(out)))
    print("KERNEL_OK")
</pallas_src>

<mosaic_0001>
module attributes {stable_mosaic.version = 11 : i64} {
  func.func @conv_pool_kernel(%arg0: i32, %arg1: memref<512x36xbf16, #tpu.memory_space<vmem>>, %arg2: memref<36x32xbf16, #tpu.memory_space<vmem>>, %arg3: memref<1x32xf32, #tpu.memory_space<vmem>>, %arg4: memref<1x32xf32, #tpu.memory_space<vmem>>, %arg5: memref<128x32xbf16, #tpu.memory_space<vmem>>) attributes {dimension_semantics = [#tpu.dimension_semantics<arbitrary>], iteration_bounds = array<i64: 1>, scalar_prefetch = 0 : i64, scratch_operands = 0 : i64, tpu.core_type = #tpu.core_type<tc>, window_params = [{pipeline_mode = #tpu.pipeline_mode<synchronous>, transform_indices = @transform_0, window_bounds = array<i64: 512, 36>}, {pipeline_mode = #tpu.pipeline_mode<synchronous>, transform_indices = @transform_1, window_bounds = array<i64: 36, 32>}, {pipeline_mode = #tpu.pipeline_mode<synchronous>, transform_indices = @transform_2, window_bounds = array<i64: 1, 32>}, {pipeline_mode = #tpu.pipeline_mode<synchronous>, transform_indices = @transform_3, window_bounds = array<i64: 1, 32>}, {pipeline_mode = #tpu.pipeline_mode<synchronous>, transform_indices = @transform_4, window_bounds = array<i64: 128, 32>}]} {
    %c0 = arith.constant 0 : index
    %c0_0 = arith.constant 0 : index
    %0 = vector.load %arg1[%c0, %c0_0] : memref<512x36xbf16, #tpu.memory_space<vmem>>, vector<512x36xbf16>
    %c0_1 = arith.constant 0 : index
    %c0_2 = arith.constant 0 : index
    %1 = vector.load %arg2[%c0_1, %c0_2] : memref<36x32xbf16, #tpu.memory_space<vmem>>, vector<36x32xbf16>
    %cst = arith.constant dense<0.000000e+00> : vector<512x32xf32>
    %2 = tpu.matmul %0, %1, %cst {dimension_numbers = #tpu.dot_dimension_numbers<[1], [0], [0], [1], [0, 0, 1, 1], [], []>} : vector<512x36xbf16>, vector<36x32xbf16>, vector<512x32xf32> -> vector<512x32xf32>
    %c0_3 = arith.constant 0 : index
    %c0_4 = arith.constant 0 : index
    %3 = vector.load %arg3[%c0_3, %c0_4] : memref<1x32xf32, #tpu.memory_space<vmem>>, vector<1x32xf32>
    %4 = vector.broadcast %3 : vector<1x32xf32> to vector<512x32xf32>
    %5 = arith.mulf %2, %4 : vector<512x32xf32>
    %c0_5 = arith.constant 0 : index
    %c0_6 = arith.constant 0 : index
    %6 = vector.load %arg4[%c0_5, %c0_6] : memref<1x32xf32, #tpu.memory_space<vmem>>, vector<1x32xf32>
    %7 = vector.broadcast %6 : vector<1x32xf32> to vector<512x32xf32>
    %8 = arith.addf %5, %7 : vector<512x32xf32>
    %cst_7 = arith.constant 0.000000e+00 : f32
    %9 = vector.broadcast %cst_7 : f32 to vector<512x32xf32>
    %10 = arith.maximumf %8, %9 : vector<512x32xf32>
    %11 = vector.shape_cast %10 : vector<512x32xf32> to vector<128x4x32xf32>
    %cst_8 = arith.constant dense<0xFF800000> : vector<128x32xf32>
    %12 = vector.multi_reduction <maximumf>, %11, %cst_8 [1] : vector<128x4x32xf32> to vector<128x32xf32>
    %13 = arith.truncf %12 : vector<128x32xf32> to vector<128x32xbf16>
    %c0_9 = arith.constant 0 : index
    %c0_10 = arith.constant 0 : index
    %14 = vector.load %arg5[%c0_9, %c0_10] : memref<128x32xbf16, #tpu.memory_space<vmem>>, vector<128x32xbf16>
    tpu.vector_store %arg5[%c0_9, %c0_10], %13 {strides = array<i32>} : memref<128x32xbf16, #tpu.memory_space<vmem>>, vector<128x32xbf16>,
    return
  }
  func.func @transform_0(%arg0: i32) -> (i32, i32) {
    %c0_i32 = arith.constant 0 : i32
    %c0_i32_0 = arith.constant 0 : i32
    %c0_i32_1 = arith.constant 0 : i32
    return %c0_i32, %c0_i32_0 : i32, i32
  }
  func.func @transform_1(%arg0: i32) -> (i32, i32) {
    %c0_i32 = arith.constant 0 : i32
    %c0_i32_0 = arith.constant 0 : i32
    %c0_i32_1 = arith.constant 0 : i32
    return %c0_i32, %c0_i32_0 : i32, i32
  }
  func.func @transform_2(%arg0: i32) -> (i32, i32) {
    %c0_i32 = arith.constant 0 : i32
    %c0_i32_0 = arith.constant 0 : i32
    %c0_i32_1 = arith.constant 0 : i32
    return %c0_i32, %c0_i32_0 : i32, i32
  }
  func.func @transform_3(%arg0: i32) -> (i32, i32) {
    %c0_i32 = arith.constant 0 : i32
    %c0_i32_0 = arith.constant 0 : i32
    %c0_i32_1 = arith.constant 0 : i32
    return %c0_i32, %c0_i32_0 : i32, i32
  }
  func.func @transform_4(%arg0: i32) -> (i32, i32) {
    %c0_i32 = arith.constant 0 : i32
    %c0_i32_0 = arith.constant 0 : i32
    %c0_i32_1 = arith.constant 0 : i32
    return %c0_i32, %c0_i32_0 : i32, i32
  }
}

</mosaic_0001>

<bundles_post_ra>
// kernel: tpu_custom_call.1
= control target key start
LH: loop header
LB: loop body
LE: loop exit
PB: predicated region body
PF: predicated region fallthrough
CT: control target
= control target key end

     0   :  { %vm262_vm0 = vcmask 293888   ;;  %vm359_vm1 = vcmask 1041408   ;;  %vm1050_vm2 = vcmask 257024   ;;  %vm2587_vm3 = vcmask 1041409   ;;  %s4208_s1 = inlined_call_operand.vmem [shape: bf16[36,32], index: 1, kind: input, shape index: {}]   ;;  %s4209_s0 = inlined_call_operand.vmem [shape: bf16[512,36], index: 0, kind: input, shape index: {}]   ;;  %s4210_s2 = inlined_call_operand.vmem [shape: f32[1,32], index: 2, kind: input, shape index: {}]   ;;  %s4211_s3 = inlined_call_operand.vmem [shape: f32[1,32], index: 3, kind: input, shape index: {}]   ;;  %s4212_s4 = inlined_call_operand.vmem [shape: bf16[128,32], index: 4, kind: output, shape index: {}]  }
   0x1   :  { %v3196_v0 = vld [vmem:[%s4208_s1] sm:$0xff]   ;;  %v3197_v1 = vld [vmem:[%s4208_s1 + $0x8] sm:$0xff]   ;;  %v3198_v2 = vld [vmem:[%s4208_s1 + $0x10] ss:$0 sps:$4 sm:$0x33]   ;;  %vm2589_vm4 = vcmask 1042434  }
   0x2   :  { %3118 = vmatprep.subr.bf16.mxu0 %v3196_v0  ;;  %3188 = vmatprep.subr.bf16.mxu1 %v3196_v0  ;;  %v3199_v3 = vld [vmem:[%s4209_s0] sm:$0xff]   ;;  %v361_v5 = vsel %vm359_vm1, %v3198_v2, 0  ;;  %v3201_v6 = vld [vmem:[%s4209_s0 + $0x8] sm:$0xff]   ;;  %v3203_v8 = vld [vmem:[%s4209_s0 + $0x10] sm:$0xff]   ;;  %vm2591_vm5 = vcmask 1043459   ;;  %vm2593_vm6 = vcmask 1044484  }
   0x3   :  { %3119 = vmatpush3.bf16.msra.mxu0 %v3196_v0  ;;  %3191 = vmatpush3.bf16.msra.mxu1 %v3196_v0  ;;  %v3200_v4 = vld [vmem:[%s4209_s0 + $0x80] sm:$0xff]   ;;  %v3202_v7 = vld [vmem:[%s4209_s0 + $0x88] sm:$0xff]   ;;  %v3204_v9 = vld [vmem:[%s4209_s0 + $0x90] sm:$0xff]   ;;  %vm2595_vm7 = vcmask 1045509   ;;  %vm2597_vm8 = vcmask 1046534   ;;  %vm2599_vm9 = vcmask 1047559  }
   0x4   :  { %3120 = vmatprep.subr.bf16.mxu0 %v3197_v1  ;;  %3189 = vmatprep.subr.bf16.mxu1 %v3197_v1  ;;  %v3205_v10 = vld [vmem:[%s4209_s0 + $0x18] sm:$0xff]   ;;  %v3207_v12 = vld [vmem:[%s4209_s0 + $0x20] sm:$0xff]   ;;  %v3209_v14 = vld [vmem:[%s4209_s0 + $0x28] sm:$0xff]  }
   0x5   :  { %3124 = vmatprep.mubr.msk.bf16.mxu0 %vm262_vm0, %v3199_v3  ;;  %3156 = vmatprep.mubr.msk.bf16.mxu1 %vm262_vm0, %v3200_v4  ;;  %v3206_v11 = vld [vmem:[%s4209_s0 + $0x98] sm:$0xff]   ;;  %v3208_v13 = vld [vmem:[%s4209_s0 + $0xa0] sm:$0xff]   ;;  %v3210_v15 = vld [vmem:[%s4209_s0 + $0xa8] sm:$0xff]  }
   0x6   :  { %v3211_v16 = vld [vmem:[%s4209_s0 + $0x30] sm:$0xff]   ;;  %v3213_v18 = vld [vmem:[%s4209_s0 + $0x38] sm:$0xff]   ;;  %v3215_v20 = vld [vmem:[%s4209_s0 + $0x40] sm:$0xff]  }
   0x7   :  { %3121 = vmatpush3.bf16.msra.mxu0 %v3197_v1  ;;  %3192 = vmatpush3.bf16.msra.mxu1 %v3197_v1  ;;  %v3212_v17 = vld [vmem:[%s4209_s0 + $0xb0] sm:$0xff]   ;;  %v3214_v19 = vld [vmem:[%s4209_s0 + $0xb8] sm:$0xff]   ;;  %v3216_v21 = vld [vmem:[%s4209_s0 + $0xc0] sm:$0xff]  }
   0x8   :  { %3194 = vmatprep.subr.msk.bf16.mxu0 %vm359_vm1, %v3198_v2  ;;  %3195 = vmatprep.subr.msk.bf16.mxu1 %vm359_vm1, %v3198_v2  ;;  %v3217_v22 = vld [vmem:[%s4209_s0 + $0x48] sm:$0xff]   ;;  %v3219_v24 = vld [vmem:[%s4209_s0 + $0x50] sm:$0xff]   ;;  %v3221_v26 = vld [vmem:[%s4209_s0 + $0x58] sm:$0xff]  }
   0x9   :  { %v3218_v23 = vld [vmem:[%s4209_s0 + $0xc8] sm:$0xff]   ;;  %v3220_v25 = vld [vmem:[%s4209_s0 + $0xd0] sm:$0xff]   ;;  %v3222_v27 = vld [vmem:[%s4209_s0 + $0xd8] sm:$0xff]  }
   0xa   :  { %v3223_v28 = vld [vmem:[%s4209_s0 + $0x60] sm:$0xff]   ;;  %v3225_v30 = vld [vmem:[%s4209_s0 + $0x68] sm:$0xff]   ;;  %v3227_v32 = vld [vmem:[%s4209_s0 + $0x70] sm:$0xff]  }
   0xb   :  { %3123 = vmatpush3.bf16.msra.mxu0 %v361_v5  ;;  %3193 = vmatpush3.bf16.msra.mxu1 %v361_v5  ;;  %v3224_v29 = vld [vmem:[%s4209_s0 + $0xe0] sm:$0xff]   ;;  %v3226_v31 = vld [vmem:[%s4209_s0 + $0xe8] sm:$0xff]   ;;  %v3228_v33 = vld [vmem:[%s4209_s0 + $0xf0] sm:$0xff]  }
   0xc   :  { %v3229_v34 = vld [vmem:[%s4209_s0 + $0x78] sm:$0xff]   ;;  %v3400_v36 = vld [vmem:[%s4210_s2] ss:$0 sm:$0xff] }
   0xd   :  { %v3230_v35 = vld [vmem:[%s4209_s0 + $0xf8] sm:$0xff]   ;;  %v3405_v38 = vld [vmem:[%s4211_s3] ss:$0 sm:$0xff] }
   0xe   :  { %3125 = vmatmul.mubr.msk.bf16.vlgmr.msra.gmra.mrb[0].mxu0 %vm262_vm0, %v3201_v6  ;;  %3157 = vmatmul.mubr.msk.bf16.vlgmr.msra.gmra.mrb[0].mxu1 %vm262_vm0, %v3202_v7 }
   0xf   :  { %3128 = vmatprep.mubr.msk.bf16.mxu0 %vm262_vm0, %v3203_v8  ;;  %3160 = vmatprep.mubr.msk.bf16.mxu1 %vm262_vm0, %v3204_v9 }
  0x16   :  { %3129 = vmatmul.mubr.msk.bf16.gmra.mrb[4].mxu0 %vm262_vm0, %v3205_v10  ;;  %3161 = vmatmul.mubr.msk.bf16.gmra.mrb[4].mxu1 %vm262_vm0, %v3206_v11 }
  0x17   :  { %3132 = vmatprep.mubr.msk.bf16.mxu0 %vm262_vm0, %v3207_v12  ;;  %3164 = vmatprep.mubr.msk.bf16.mxu1 %vm262_vm0, %v3208_v13 }
  0x1e   :  { %3133 = vmatmul.mubr.msk.bf16.gmra.mrb[8].mxu0 %vm262_vm0, %v3209_v14  ;;  %3165 = vmatmul.mubr.msk.bf16.gmra.mrb[8].mxu1 %vm262_vm0, %v3210_v15 }
  0x1f   :  { %3136 = vmatprep.mubr.msk.bf16.mxu0 %vm262_vm0, %v3211_v16  ;;  %3168 = vmatprep.mubr.msk.bf16.mxu1 %vm262_vm0, %v3212_v17 }
  0x26   :  { %3137 = vmatmul.mubr.msk.bf16.gmra.mrb[12].mxu0 %vm262_vm0, %v3213_v18  ;;  %3169 = vmatmul.mubr.msk.bf16.gmra.mrb[12].mxu1 %vm262_vm0, %v3214_v19 }
  0x27   :  { %3140 = vmatprep.mubr.msk.bf16.mxu0 %vm262_vm0, %v3215_v20  ;;  %3172 = vmatprep.mubr.msk.bf16.mxu1 %vm262_vm0, %v3216_v21 }
  0x2e   :  { %3141 = vmatmul.mubr.msk.bf16.gmra.mrb[16].mxu0 %vm262_vm0, %v3217_v22  ;;  %3173 = vmatmul.mubr.msk.bf16.gmra.mrb[16].mxu1 %vm262_vm0, %v3218_v23 }
  0x2f   :  { %3144 = vmatprep.mubr.msk.bf16.mxu0 %vm262_vm0, %v3219_v24  ;;  %3176 = vmatprep.mubr.msk.bf16.mxu1 %vm262_vm0, %v3220_v25 }
  0x36   :  { %3145 = vmatmul.mubr.msk.bf16.gmra.mrb[20].mxu0 %vm262_vm0, %v3221_v26  ;;  %3177 = vmatmul.mubr.msk.bf16.gmra.mrb[20].mxu1 %vm262_vm0, %v3222_v27 }
  0x37   :  { %3148 = vmatprep.mubr.msk.bf16.mxu0 %vm262_vm0, %v3223_v28  ;;  %3180 = vmatprep.mubr.msk.bf16.mxu1 %vm262_vm0, %v3224_v29 }
  0x3e   :  { %3149 = vmatmul.mubr.msk.bf16.gmra.mrb[24].mxu0 %vm262_vm0, %v3225_v30  ;;  %3181 = vmatmul.mubr.msk.bf16.gmra.mrb[24].mxu1 %vm262_vm0, %v3226_v31 }
  0x3f   :  { %3152 = vmatprep.mubr.msk.bf16.mxu0 %vm262_vm0, %v3227_v32  ;;  %3184 = vmatprep.mubr.msk.bf16.mxu1 %vm262_vm0, %v3228_v33 }
  0x46   :  { %3153 = vmatmul.mubr.msk.bf16.gmra.mrb[28].mxu0 %vm262_vm0, %v3229_v34  ;;  %3185 = vmatmul.mubr.msk.bf16.gmra.mrb[28].mxu1 %vm262_vm0, %v3230_v35 }
  0xe1   :  { %v3126_v37 = vpop.f32.mrb[0].mxu0  ;;  %v3158_v39 = vpop.f32.mrb[0].mxu1 }
  0xe2   :  { %v661_v40 = vmul.f32 %v3126_v37, %v3400_v36  ;;  %v693_v41 = vmul.f32 %v3158_v39, %v3400_v36  ;;  %v397_v42 = vpop.f32.mrb[1].mxu0  ;;  %v525_v43 = vpop.f32.mrb[1].mxu1 }
  0xe3   :  { %v659_v44 = vmul.f32 %v3400_v36, %v397_v42  ;;  %v691_v45 = vmul.f32 %v3400_v36, %v525_v43  ;;  %v3127_v46 = vpop.f32.mrb[2].mxu0  ;;  %v3159_v47 = vpop.f32.mrb[2].mxu1 }
  0xe4   :  { %v732_v48 = vadd.f32 %v3405_v38, %v661_v40  ;;  %v764_v49 = vadd.f32 %v3405_v38, %v693_v41  ;;  %v662_v50 = vmul.f32 %v3127_v46, %v3400_v36  ;;  %v694_v51 = vmul.f32 %v3159_v47, %v3400_v36  ;;  %v400_v52 = vpop.f32.mrb[3].mxu0  ;;  %v528_v53 = vpop.f32.mrb[3].mxu1 }
  0xe5   :  { %v730_v54 = vadd.f32 %v3405_v38, %v659_v44  ;;  %v762_v55 = vadd.f32 %v3405_v38, %v691_v45  ;;  %v660_v56 = vmul.f32 %v3400_v36, %v400_v52  ;;  %v692_v57 = vmul.f32 %v3400_v36, %v528_v53 }
  0xe6   :  { %v796_v58 = vmax.f32 %v732_v48, 0.0  ;;  %v828_v59 = vmax.f32 %v764_v49, 0.0  ;;  %v3420_v60 = vadd.f32 %v3405_v38, %v662_v50  ;;  %v3423_v61 = vadd.f32 %v3405_v38, %v694_v51 }
  0xe7   :  { %v794_v62 = vmax.f32 %v730_v54, 0.0  ;;  %v826_v63 = vmax.f32 %v762_v55, 0.0  ;;  %v3426_v0 = vadd.f32 %v3405_v38, %v660_v56  ;;  %v3429_v1 = vadd.f32 %v3405_v38, %v692_v57 }
  0xe8   :  { %v924_v2 = vcombine.high %v796_v58, %v796_v58  ;;  %v1079_v3 = vsel %vm1050_vm2, %v796_v58, -inf  ;;  %v956_v4 = vcombine.high %v828_v59, %v828_v59  ;;  %v1527_v5 = vsel %vm1050_vm2, %v828_v59, -inf }
  0xe9   :  { %v1080_v6 = vrot.slane %v1079_v3, 4  ;;  %v1528_v7 = vrot.slane %v1527_v5, 4  ;;  %v922_v8 = vcombine.high %v794_v62, %v794_v62  ;;  %v1051_v9 = vsel %vm1050_vm2, %v794_v62, -inf  ;;  %v3434_v10 = vpop.f32.mrb[4].mxu0  ;;  %v3436_v11 = vpop.f32.mrb[4].mxu1 }
  0xea   :  { %v1086_v12 = vsel %vm1050_vm2, %v924_v2, -inf  ;;  %v1534_v13 = vsel %vm1050_vm2, %v956_v4, -inf  ;;  %v1052_v14 = vrot.slane %v1051_v9, 4  ;;  %v954_v15 = vcombine.high %v826_v63, %v826_v63  ;;  %v3440_v16 = vpop.f32.mrb[5].mxu0  ;;  %v3442_v17 = vpop.f32.mrb[5].mxu1 }
  0xeb   :  { %v1081_v18 = vmax.f32 %v1079_v3, %v1080_v6  ;;  %v1087_v19 = vrot.slane %v1086_v12, 4  ;;  %v1529_v20 = vmax.f32 %v1527_v5, %v1528_v7  ;;  %v1535_v21 = vrot.slane %v1534_v13, 4  ;;  %v3444_v22 = vpop.f32.mrb[6].mxu0  ;;  %v3446_v23 = vpop.f32.mrb[6].mxu1 }
  0xec   :  { %v1053_v24 = vmax.f32 %v1051_v9, %v1052_v14  ;;  %v1058_v25 = vsel %vm1050_vm2, %v922_v8, -inf  ;;  %v1499_v26 = vsel %vm1050_vm2, %v826_v63, -inf  ;;  %v1506_v27 = vsel %vm1050_vm2, %v954_v15, -inf  ;;  %v3451_v28 = vpop.f32.mrb[7].mxu0  ;;  %v3453_v29 = vpop.f32.mrb[7].mxu1 }
  0xed   :  { %v1082_v30 = vrot.slane %v1081_v18, 2  ;;  %v1088_v31 = vmax.f32 %v1086_v12, %v1087_v19  ;;  %v1530_v32 = vrot.slane %v1529_v20, 2  ;;  %v1536_v33 = vmax.f32 %v1534_v13, %v1535_v21 }
  0xee   :  { %v1054_v34 = vrot.slane %v1053_v24, 2  ;;  %v1059_v35 = vrot.slane %v1058_v25, 4  ;;  %v1500_v37 = vrot.slane %v1499_v26, 4  ;;  %v1507_v39 = vrot.slane %v1506_v27, 4 }
  0xef   :  { %v1083_v40 = vmax.f32 %v1081_v18, %v1082_v30  ;;  %v1089_v41 = vrot.slane %v1088_v31, 2  ;;  %v1531_v42 = vmax.f32 %v1529_v20, %v1530_v32  ;;  %v1537_v43 = vrot.slane %v1536_v33, 2 }
  0xf0   :  { %v1055_v44 = vmax.f32 %v1053_v24, %v1054_v34  ;;  %v1060_v45 = vmax.f32 %v1058_v25, %v1059_v35  ;;  %v1501_v46 = vmax.f32 %v1499_v26, %v1500_v37  ;;  %v1508_v47 = vmax.f32 %v1506_v27, %v1507_v39 }
  0xf1   :  { %v1084_v48 = vrot.slane %v1083_v40, 1  ;;  %v1090_v49 = vmax.f32 %v1088_v31, %v1089_v41  ;;  %v1532_v50 = vrot.slane %v1531_v42, 1  ;;  %v1538_v51 = vmax.f32 %v1536_v33, %v1537_v43  ;;  %v3455_v52 = vpop.f32.mrb[8].mxu0  ;;  %v3457_v53 = vpop.f32.mrb[8].mxu1 }
  0xf2   :  { %v1056_v54 = vrot.slane %v1055_v44, 1  ;;  %v1061_v55 = vrot.slane %v1060_v45, 2  ;;  %v1502_v56 = vrot.slane %v1501_v46, 2  ;;  %v1509_v57 = vrot.slane %v1508_v47, 2  ;;  %v3459_v58 = vpop.f32.mrb[9].mxu0  ;;  %v3461_v59 = vpop.f32.mrb[9].mxu1 }
  0xf3   :  { %v1085_v62 = vmax.f32 %v1083_v40, %v1084_v48  ;;  %v1091_v63 = vrot.slane %v1090_v49, 1  ;;  %v1533_v2 = vmax.f32 %v1531_v42, %v1532_v50  ;;  %v1539_v3 = vrot.slane %v1538_v51, 1  ;;  %v3463_v4 = vpop.f32.mrb[10].mxu0  ;;  %v3465_v5 = vpop.f32.mrb[10].mxu1 }
  0xf4   :  { %v1057_v6 = vmax.f32 %v1055_v44, %v1056_v54  ;;  %v1062_v7 = vmax.f32 %v1060_v45, %v1061_v55  ;;  %v1503_v8 = vmax.f32 %v1501_v46, %v1502_v56  ;;  %v1510_v9 = vmax.f32 %v1508_v47, %v1509_v57  ;;  %v3467_v12 = vpop.f32.mrb[11].mxu0  ;;  %v3469_v13 = vpop.f32.mrb[11].mxu1 }
  0xf5   :  { %v1092_v14 = vmax.f32 %v1090_v49, %v1091_v63  ;;  %v2959_v15 = vpack.c.bf16 %v1085_v62, %v1085_v62  ;;  %v1540_v18 = vmax.f32 %v1538_v51, %v1539_v3  ;;  %v3023_v19 = vpack.c.bf16 %v1533_v2, %v1533_v2 }
  0xf6   :  { %v1063_v20 = vrot.slane %v1062_v7, 1  ;;  %v2955_v21 = vpack.c.bf16 %v1057_v6, %v1057_v6  ;;  %v1504_v24 = vrot.slane %v1503_v8, 1  ;;  %v1511_v25 = vrot.slane %v1510_v9, 1 }
  0xf7   :  { %v2960_v26 = vpack.c.bf16 %v1092_v14, %v1092_v14  ;;  %v3471_v27 = vunpack.c.l.b16 %v2959_v15  ;;  %v3024_v30 = vpack.c.bf16 %v1540_v18, %v1540_v18  ;;  %v3473_v31 = vunpack.c.l.b16 %v3023_v19 }
  0xf8   :  { %v1064_v32 = vmax.f32 %v1062_v7, %v1063_v20  ;;  %v2459_v33 = vunpack.c.l.b16 %v2955_v21  ;;  %v1505_v34 = vmax.f32 %v1503_v8, %v1504_v24  ;;  %v1512_v35 = vmax.f32 %v1510_v9, %v1511_v25 }
  0xf9   :  { %v3475_v37 = vunpack.c.l.b16 %v2960_v26  ;;  %v3477_v39 = vunpack.c.l.b16 %v3024_v30  ;;  %v797_v40 = vmax.f32 %v3420_v60, 0.0  ;;  %v829_v41 = vmax.f32 %v3423_v61, 0.0  ;;  %v3481_v42 = vpop.f32.mrb[12].mxu0  ;;  %v3483_v43 = vpop.f32.mrb[12].mxu1 }
  0xfa   :  { %v2956_v44 = vpack.c.bf16 %v1064_v32, %v1064_v32  ;;  %v3019_v45 = vpack.c.bf16 %v1505_v34, %v1505_v34  ;;  %v3020_v46 = vpack.c.bf16 %v1512_v35, %v1512_v35  ;;  %v795_v47 = vmax.f32 %v3426_v0, 0.0  ;;  %v3486_v48 = vpop.f32.mrb[13].mxu0  ;;  %v3488_v49 = vpop.f32.mrb[13].mxu1 }
  0xfb   :  { %v925_v50 = vcombine.high %v797_v40, %v797_v40  ;;  %v1093_v51 = vsel %vm1050_vm2, %v797_v40, -inf  ;;  %v957_v54 = vcombine.high %v829_v41, %v829_v41  ;;  %v1541_v60 = vsel %vm1050_vm2, %v829_v41, -inf  ;;  %v3494_v3 = vpop.f32.mrb[14].mxu0  ;;  %v3504_v20 = vpop.f32.mrb[14].mxu1 }
  0xfc   :  { %v2460_v61 = vunpack.c.l.b16 %v2956_v44  ;;  %v2523_v55 = vunpack.c.l.b16 %v3019_v45  ;;  %v2524_v56 = vunpack.c.l.b16 %v3020_v46  ;;  %v1094_v57 = vrot.slane %v1093_v51, 4  ;;  %v3509_v45 = vpop.f32.mrb[15].mxu0 }
  0xfd   :  { %v1100_v62 = vsel %vm1050_vm2, %v925_v50, -inf  ;;  %v1542_v63 = vrot.slane %v1541_v60, 4  ;;  %v1548_v2 = vsel %vm1050_vm2, %v957_v54, -inf  ;;  %v923_v0 = vcombine.high %v795_v47, %v795_v47 }
  0xfe   :  { %v3497_v6 = vsel %vm2587_vm3, %v2460_v61, %v2459_v33  ;;  %v3500_v7 = vsel %vm2587_vm3, %v2524_v56, %v2523_v55  ;;  %v1095_v8 = vmax.f32 %v1093_v51, %v1094_v57  ;;  %v1101_v9 = vrot.slane %v1100_v62, 4 }
  0xff   :  { %v1543_v14 = vmax.f32 %v1541_v60, %v1542_v63  ;;  %v1549_v15 = vrot.slane %v1548_v2, 4  ;;  %v1065_v18 = vsel %vm1050_vm2, %v795_v47, -inf  ;;  %v1072_v19 = vsel %vm1050_vm2, %v923_v0, -inf }
 0x100   :  { %v1096_v21 = vrot.slane %v1095_v8, 2  ;;  %v1102_v24 = vmax.f32 %v1100_v62, %v1101_v9  ;;  %v1066_v25 = vrot.slane %v1065_v18, 4  ;;  %v1073_v26 = vrot.slane %v1072_v19, 4 }
 0x101   :  { %v1544_v30 = vrot.slane %v1543_v14, 2  ;;  %v1550_v32 = vmax.f32 %v1548_v2, %v1549_v15  ;;  %v827_v33 = vmax.f32 %v3429_v1, 0.0  ;;  %v665_v34 = vmul.f32 %v3434_v10, %v3400_v36 }
 0x102   :  { %v1097_v35 = vmax.f32 %v1095_v8, %v1096_v21  ;;  %v1103_v40 = vrot.slane %v1102_v24, 2  ;;  %v1067_v41 = vmax.f32 %v1065_v18, %v1066_v25  ;;  %v1074_v44 = vmax.f32 %v1072_v19, %v1073_v26 }
 0x103   :  { %v1545_v46 = vmax.f32 %v1543_v14, %v1544_v30  ;;  %v1551_v47 = vrot.slane %v1550_v32, 2  ;;  %v955_v50 = vcombine.high %v827_v33, %v827_v33  ;;  %v1513_v51 = vsel %vm1050_vm2, %v827_v33, -inf }
 0x104   :  { %v1098_v54 = vrot.slane %v1097_v35, 1  ;;  %v1104_v60 = vmax.f32 %v1102_v24, %v1103_v40  ;;  %v1068_v61 = vrot.slane %v1067_v41, 2  ;;  %v1075_v55 = vrot.slane %v1074_v44, 2 }
 0x105   :  { %v1546_v56 = vrot.slane %v1545_v46, 1  ;;  %v1552_v1 = vmax.f32 %v1550_v32, %v1551_v47  ;;  %v1514_v57 = vrot.slane %v1513_v51, 4  ;;  %v1520_v10 = vsel %vm1050_vm2, %v955_v50, -inf }
 0x106   :  { %v1099_v62 = vmax.f32 %v1097_v35, %v1098_v54  ;;  %v1105_v63 = vrot.slane %v1104_v60, 1  ;;  %v1069_v2 = vmax.f32 %v1067_v41, %v1068_v61  ;;  %v1076_v0 = vmax.f32 %v1074_v44, %v1075_v55  ;;  %v3513_v44 = vpop.f32.mrb[15].mxu1 }
 0x107   :  { %v1547_v8 = vmax.f32 %v1545_v46, %v1546_v56  ;;  %v1553_v9 = vrot.slane %v1552_v1, 1  ;;  %v1515_v14 = vmax.f32 %v1513_v51, %v1514_v57  ;;  %v1521_v15 = vrot.slane %v1520_v10, 4 }
 0x108   :  { %v1106_v18 = vmax.f32 %v1104_v60, %v1105_v63  ;;  %v2961_v19 = vpack.c.bf16 %v1099_v62, %v1099_v62  ;;  %v1070_v21 = vrot.slane %v1069_v2, 1  ;;  %v1077_v24 = vrot.slane %v1076_v0, 1 }
 0x109   :  { %v1554_v25 = vmax.f32 %v1552_v1, %v1553_v9  ;;  %v3025_v26 = vpack.c.bf16 %v1547_v8, %v1547_v8  ;;  %v1516_v30 = vrot.slane %v1515_v14, 2  ;;  %v1522_v32 = vmax.f32 %v1520_v10, %v1521_v15 }
 0x10a   :  { %v2962_v33 = vpack.c.bf16 %v1106_v18, %v1106_v18  ;;  %v2465_v35 = vunpack.c.l.b16 %v2961_v19  ;;  %v1071_v40 = vmax.f32 %v1069_v2, %v1070_v21  ;;  %v1078_v41 = vmax.f32 %v1076_v0, %v1077_v24 }
 0x10b   :  { %v3026_v46 = vpack.c.bf16 %v1554_v25, %v1554_v25  ;;  %v3515_v47 = vunpack.c.l.b16 %v3025_v26  ;;  %v1517_v50 = vmax.f32 %v1515_v14, %v1516_v30  ;;  %v1523_v51 = vrot.slane %v1522_v32, 2 }
 0x10c   :  { %v2466_v54 = vunpack.c.l.b16 %v2962_v33  ;;  %v2957_v60 = vpack.c.bf16 %v1071_v40, %v1071_v40  ;;  %v2958_v61 = vpack.c.bf16 %v1078_v41, %v1078_v41  ;;  %v736_v55 = vadd.f32 %v3405_v38, %v665_v34 }
 0x10d   :  { %v2530_v56 = vunpack.c.l.b16 %v3026_v46  ;;  %v1518_v1 = vrot.slane %v1517_v50, 1  ;;  %v1524_v57 = vmax.f32 %v1522_v32, %v1523_v51  ;;  %v697_v10 = vmul.f32 %v3436_v11, %v3400_v36 }
 0x10e   :  { %v2461_v62 = vunpack.c.l.b16 %v2957_v60  ;;  %v2462_v63 = vunpack.c.l.b16 %v2958_v61  ;;  %v800_v2 = vmax.f32 %v736_v55, 0.0  ;;  %v663_v0 = vmul.f32 %v3400_v36, %v3440_v16 }
 0x10f   :  { %v1519_v8 = vmax.f32 %v1517_v50, %v1518_v1  ;;  %v1525_v9 = vrot.slane %v1524_v57, 1  ;;  %v768_v14 = vadd.f32 %v3405_v38, %v697_v10  ;;  %v695_v15 = vmul.f32 %v3400_v36, %v3442_v17 }
 0x110   :  { %v2590_v34 = vsel %vm2589_vm4, %v2461_v62, %v3497_v6  ;;  %v928_v18 = vcombine.high %v800_v2, %v800_v2  ;;  %v1135_v19 = vsel %vm1050_vm2, %v800_v2, -inf  ;;  %v734_v11 = vadd.f32 %v3405_v38, %v663_v0  ;;  %v3543_v2 = vpop.f32.mrb[16].mxu1 }
 0x111   :  { %v2592_v21 = vsel %vm2591_vm5, %v2462_v63, %v2590_v34  ;;  %v1526_v24 = vmax.f32 %v1524_v57, %v1525_v9  ;;  %v3021_v25 = vpack.c.bf16 %v1519_v8, %v1519_v8  ;;  %v1136_v16 = vrot.slane %v1135_v19, 4  ;;  %v3541_v63 = vpop.f32.mrb[16].mxu0 }
 0x112   :  { %v2594_v26 = vsel %vm2593_vm6, %v3471_v27, %v2592_v21  ;;  %v1142_v30 = vsel %vm1050_vm2, %v928_v18, -inf  ;;  %v832_v32 = vmax.f32 %v768_v14, 0.0  ;;  %v798_v17 = vmax.f32 %v734_v11, 0.0 }
 0x113   :  { %v2596_v6 = vsel %vm2595_vm7, %v3475_v37, %v2594_v26  ;;  %v3022_v33 = vpack.c.bf16 %v1526_v24, %v1526_v24  ;;  %v2525_v40 = vunpack.c.l.b16 %v3021_v25  ;;  %v1137_v41 = vmax.f32 %v1135_v19, %v1136_v16 }
 0x114   :  { %v2598_v46 = vsel %vm2597_vm8, %v2465_v35, %v2596_v6  ;;  %v1143_v50 = vrot.slane %v1142_v30, 4  ;;  %v960_v51 = vcombine.high %v832_v32, %v832_v32  ;;  %v1583_v60 = vsel %vm1050_vm2, %v832_v32, -inf }
 0x115   :  { %v2600_v61 = vsel %vm2599_vm9, %v2466_v54, %v2598_v46  ;;  %v2526_v55 = vunpack.c.l.b16 %v3022_v33  ;;  %v2651_v27 = vsel %vm2589_vm4, %v2525_v40, %v3500_v7  ;;  %v1138_v1 = vrot.slane %v1137_v41, 2  ;;  %v3559_v40 = vpop.f32.mrb[17].mxu0 }
 0x116   :  { %v2706_v57 = vpack.c.b16 %v2600_v61, %v2600_v61  ;;  %v1144_v10 = vmax.f32 %v1142_v30, %v1143_v50  ;;  %v1584_v62 = vrot.slane %v1583_v60, 4  ;;  %v1590_v37 = vsel %vm1050_vm2, %v960_v51, -inf }
 0x117   :  { %v2652_v35 = vsel %vm2591_vm5, %v2526_v55, %v2651_v27  ;;  %v1139_v0 = vmax.f32 %v1137_v41, %v1138_v1  ;;  %v1591_v8 = vrot.slane %v1590_v37, 4  ;;  %v926_v9 = vcombine.high %v798_v17, %v798_v17 }
 0x118   :  { %2738 = vst.msk [vmem:[%s4212_s4] sm:$0xf] %vm1050_vm2, %v2706_v57  ;;  %v2653_v7 = vsel %vm2593_vm6, %v3473_v31, %v2652_v35  ;;  %v1145_v54 = vrot.slane %v1144_v10, 2  ;;  %v1585_v14 = vmax.f32 %v1583_v60, %v1584_v62  ;;  %v1107_v34 = vsel %vm1050_vm2, %v798_v17, -inf }
 0x119   :  { %v2654_v18 = vsel %vm2595_vm7, %v3477_v39, %v2653_v7  ;;  %v1140_v19 = vrot.slane %v1139_v0, 1  ;;  %v1592_v11 = vmax.f32 %v1590_v37, %v1591_v8  ;;  %v1108_v21 = vrot.slane %v1107_v34, 4 }
 0x11a   :  { %v2655_v24 = vsel %vm2597_vm8, %v3515_v47, %v2654_v18  ;;  %v1146_v25 = vmax.f32 %v1144_v10, %v1145_v54  ;;  %v1586_v16 = vrot.slane %v1585_v14, 2  ;;  %v1114_v26 = vsel %vm1050_vm2, %v926_v9, -inf }
 0x11b   :  { %v2656_v30 = vsel %vm2599_vm9, %v2530_v56, %v2655_v24  ;;  %v1593_v31 = vrot.slane %v1592_v11, 2  ;;  %v1109_v32 = vmax.f32 %v1107_v34, %v1108_v21  ;;  %v1141_v33 = vmax.f32 %v1139_v0, %v1140_v19  ;;  %v3574_v21 = vpop.f32.mrb[17].mxu1 }
 0x11c   :  { %v2714_v6 = vpack.c.b16 %v2656_v30, %v2656_v30  ;;  %v1115_v17 = vrot.slane %v1114_v26, 4  ;;  %v1147_v39 = vrot.slane %v1146_v25, 1  ;;  %v766_v46 = vadd.f32 %v3405_v38, %v695_v15 }
 0x11d   :  { %v1110_v41 = vrot.slane %v1109_v32, 2  ;;  %v1587_v47 = vmax.f32 %v1585_v14, %v1586_v16  ;;  %v666_v56 = vmul.f32 %v3444_v22, %v3400_v36  ;;  %v1594_v51 = vmax.f32 %v1592_v11, %v1593_v31 }
 0x11e   :  { %2746 = vst.msk [vmem:[%s4212_s4 + $0x20] sm:$0xf] %vm1050_vm2, %v2714_v6  ;;  %v1116_v50 = vmax.f32 %v1114_v26, %v1115_v17  ;;  %v830_v60 = vmax.f32 %v766_v46, 0.0  ;;  %v2967_v61 = vpack.c.bf16 %v1141_v33, %v1141_v33  ;;  %v1148_v1 = vmax.f32 %v1146_v25, %v1147_v39 }
 0x11f   :  { %v737_v27 = vadd.f32 %v3405_v38, %v666_v56  ;;  %v1111_v57 = vmax.f32 %v1109_v32, %v1110_v41  ;;  %v1588_v62 = vrot.slane %v1587_v47, 1  ;;  %v1595_v0 = vrot.slane %v1594_v51, 1 }
 0x120   :  { %v1117_v55 = vrot.slane %v1116_v50, 2  ;;  %v958_v10 = vcombine.high %v830_v60, %v830_v60  ;;  %v1555_v15 = vsel %vm1050_vm2, %v830_v60, -inf  ;;  %v3571_v7 = vunpack.c.l.b16 %v2967_v61 }
 0x121   :  { %v1556_v35 = vrot.slane %v1555_v15, 4  ;;  %v801_v9 = vmax.f32 %v737_v27, 0.0  ;;  %v2968_v34 = vpack.c.bf16 %v1148_v1, %v1148_v1  ;;  %v1112_v18 = vrot.slane %v1111_v57, 1 }
 0x122   :  { %v1118_v37 = vmax.f32 %v1116_v50, %v1117_v55  ;;  %v1562_v8 = vsel %vm1050_vm2, %v958_v10, -inf  ;;  %v3576_v24 = vmax.f32 %v1587_v47, %v1588_v62  ;;  %v3578_v30 = vmax.f32 %v1594_v51, %v1595_v0  ;;  %v3591_v10 = vpop.f32.mrb[18].mxu0 }
 0x123   :  { %v1557_v54 = vmax.f32 %v1555_v15, %v1556_v35  ;;  %v1563_v14 = vrot.slane %v1562_v8, 4  ;;  %v929_v19 = vcombine.high %v801_v9, %v801_v9  ;;  %v1149_v11 = vsel %vm1050_vm2, %v801_v9, -inf }
 0x124   :  { %v1119_v22 = vrot.slane %v1118_v37, 1  ;;  %v1150_v26 = vrot.slane %v1149_v11, 4  ;;  %v698_v32 = vmul.f32 %v3446_v23, %v3400_v36  ;;  %v664_v6 = vmul.f32 %v3400_v36, %v3451_v28 }
 0x125   :  { %v1558_v25 = vrot.slane %v1557_v54, 2  ;;  %v1564_v16 = vmax.f32 %v1562_v8, %v1563_v14  ;;  %v1156_v31 = vsel %vm1050_vm2, %v929_v19, -inf  ;;  %v1113_v46 = vmax.f32 %v1111_v57, %v1112_v18 }
 0x126   :  { %v1120_v33 = vmax.f32 %v1118_v37, %v1119_v22  ;;  %v1151_v41 = vmax.f32 %v1149_v11, %v1150_v26  ;;  %v1157_v47 = vrot.slane %v1156_v31, 4  ;;  %v769_v50 = vadd.f32 %v3405_v38, %v698_v32 }
 0x127   :  { %v1559_v17 = vmax.f32 %v1557_v54, %v1558_v25  ;;  %v1565_v39 = vrot.slane %v1564_v16, 2  ;;  %v735_v56 = vadd.f32 %v3405_v38, %v664_v6  ;;  %v696_v55 = vmul.f32 %v3400_v36, %v3453_v29 }
 0x128   :  { %v1152_v61 = vrot.slane %v1151_v41, 2  ;;  %v3589_v23 = vunpack.c.l.b16 %v2968_v34  ;;  %v1158_v27 = vmax.f32 %v1156_v31, %v1157_v47  ;;  %v833_v28 = vmax.f32 %v769_v50, 0.0 }
 0x129   :  { %v1560_v51 = vrot.slane %v1559_v17, 1  ;;  %v1566_v60 = vmax.f32 %v1564_v16, %v1565_v39  ;;  %v799_v1 = vmax.f32 %v735_v56, 0.0  ;;  %v2964_v15 = vpack.c.bf16 %v1120_v33, %v1120_v33  ;;  %v3600_v39 = vpop.f32.mrb[18].mxu1 }
 0x12a   :  { %v1153_v37 = vmax.f32 %v1151_v41, %v1152_v61  ;;  %v1159_v35 = vrot.slane %v1158_v27, 2  ;;  %v961_v0 = vcombine.high %v833_v28, %v833_v28  ;;  %v1597_v8 = vsel %vm1050_vm2, %v833_v28, -inf }
 0x12b   :  { %v1561_v57 = vmax.f32 %v1559_v17, %v1560_v51  ;;  %v1567_v62 = vrot.slane %v1566_v60, 1  ;;  %v927_v9 = vcombine.high %v799_v1, %v799_v1  ;;  %v2963_v22 = vpack.c.bf16 %v1113_v46, %v1113_v46 }
 0x12c   :  { %v1598_v14 = vrot.slane %v1597_v8, 4  ;;  %v767_v29 = vadd.f32 %v3405_v38, %v696_v55  ;;  %v1160_v34 = vmax.f32 %v1158_v27, %v1159_v35  ;;  %v1604_v18 = vsel %vm1050_vm2, %v961_v0, -inf }
 0x12d   :  { %v1568_v54 = vmax.f32 %v1566_v60, %v1567_v62  ;;  %v1121_v19 = vsel %vm1050_vm2, %v799_v1, -inf  ;;  %v1128_v11 = vsel %vm1050_vm2, %v927_v9, -inf  ;;  %v3031_v25 = vpack.c.bf16 %v3576_v24, %v3576_v24 }
 0x12e   :  { %v2468_v16 = vunpack.c.l.b16 %v2964_v15  ;;  %v1154_v26 = vrot.slane %v1153_v37, 1  ;;  %v1599_v31 = vmax.f32 %v1597_v8, %v1598_v14  ;;  %v3027_v32 = vpack.c.bf16 %v1561_v57, %v1561_v57  ;;  %v3605_v15 = vpop.f32.mrb[19].mxu0 }
 0x12f   :  { %v1605_v6 = vrot.slane %v1604_v18, 4  ;;  %v1122_v33 = vrot.slane %v1121_v19, 4  ;;  %v1129_v17 = vrot.slane %v1128_v11, 4  ;;  %v2467_v41 = vunpack.c.l.b16 %v2963_v22 }
 0x130   :  { %v3028_v46 = vpack.c.bf16 %v1568_v54, %v1568_v54  ;;  %v1161_v47 = vrot.slane %v1160_v34, 1  ;;  %v831_v50 = vmax.f32 %v767_v29, 0.0  ;;  %v1600_v56 = vrot.slane %v1599_v31, 2 }
 0x131   :  { %v1606_v51 = vmax.f32 %v1604_v18, %v1605_v6  ;;  %v1123_v60 = vmax.f32 %v1121_v19, %v1122_v33  ;;  %v1130_v61 = vmax.f32 %v1128_v11, %v1129_v17  ;;  %v2601_v27 = vsel %vm2587_vm3, %v2468_v16, %v2467_v41 }
 0x132   :  { %v1155_v28 = vmax.f32 %v1153_v37, %v1154_v26  ;;  %v959_v1 = vcombine.high %v831_v50, %v831_v50  ;;  %v2531_v57 = vunpack.c.l.b16 %v3027_v32  ;;  %v2532_v8 = vunpack.c.l.b16 %v3028_v46  ;;  %v3612_v32 = vpop.f32.mrb[19].mxu1 }
 0x133   :  { %v1607_v62 = vrot.slane %v1606_v51, 2  ;;  %v1124_v35 = vrot.slane %v1123_v60, 2  ;;  %v1131_v0 = vrot.slane %v1130_v61, 2  ;;  %v1569_v9 = vsel %vm1050_vm2, %v831_v50, -inf }
 0x134   :  { %v1576_v22 = vsel %vm1050_vm2, %v959_v1, -inf  ;;  %v669_v54 = vmul.f32 %v3455_v52, %v3400_v36  ;;  %v1162_v14 = vmax.f32 %v1160_v34, %v1161_v47  ;;  %v1601_v29 = vmax.f32 %v1599_v31, %v1600_v56 }
 0x135   :  { %v1125_v18 = vmax.f32 %v1123_v60, %v1124_v35  ;;  %v1132_v19 = vmax.f32 %v1130_v61, %v1131_v0  ;;  %v2969_v37 = vpack.c.bf16 %v1155_v28, %v1155_v28  ;;  %v1570_v11 = vrot.slane %v1569_v9, 4 }
 0x136   :  { %v1577_v16 = vrot.slane %v1576_v22, 4  ;;  %v740_v26 = vadd.f32 %v3405_v38, %v669_v54  ;;  %v1608_v6 = vmax.f32 %v1606_v51, %v1607_v62  ;;  %v701_v41 = vmul.f32 %v3457_v53, %v3400_v36 }
 0x137   :  { %v1126_v33 = vrot.slane %v1125_v18, 1  ;;  %v1133_v17 = vrot.slane %v1132_v19, 1  ;;  %v2657_v46 = vsel %vm2587_vm3, %v2532_v8, %v2531_v57  ;;  %v1571_v52 = vmax.f32 %v1569_v9, %v1570_v11 }
 0x138   :  { %v1578_v34 = vmax.f32 %v1576_v22, %v1577_v16  ;;  %v804_v31 = vmax.f32 %v740_v26, 0.0  ;;  %v2970_v47 = vpack.c.bf16 %v1162_v14, %v1162_v14  ;;  %v1602_v50 = vrot.slane %v1601_v29, 1 }
 0x139   :  { %v1127_v56 = vmax.f32 %v1125_v18, %v1126_v33  ;;  %v1134_v60 = vmax.f32 %v1132_v19, %v1133_v17  ;;  %v1572_v61 = vrot.slane %v1571_v52, 2  ;;  %v772_v35 = vadd.f32 %v3405_v38, %v701_v41 }
 0x13a   :  { %v1579_v28 = vrot.slane %v1578_v34, 2  ;;  %v932_v1 = vcombine.high %v804_v31, %v804_v31  ;;  %v1609_v51 = vrot.slane %v1608_v6, 1  ;;  %v1191_v54 = vsel %vm1050_vm2, %v804_v31, -inf }
 0x13b   :  { %v2965_v62 = vpack.c.bf16 %v1127_v56, %v1127_v56  ;;  %v2966_v0 = vpack.c.bf16 %v1134_v60, %v1134_v60  ;;  %v1573_v53 = vmax.f32 %v1571_v52, %v1572_v61  ;;  %v1192_v57 = vrot.slane %v1191_v54, 4 }
 0x13c   :  { %v1580_v55 = vmax.f32 %v1578_v34, %v1579_v28  ;;  %v1198_v8 = vsel %vm1050_vm2, %v932_v1, -inf  ;;  %v2473_v9 = vunpack.c.l.b16 %v2969_v37  ;;  %v2474_v19 = vunpack.c.l.b16 %v2970_v47 }
 0x13d   :  { %v2469_v22 = vunpack.c.l.b16 %v2965_v62  ;;  %v2470_v14 = vunpack.c.l.b16 %v2966_v0  ;;  %v1199_v18 = vrot.slane %v1198_v8, 4  ;;  %v1574_v11 = vrot.slane %v1573_v53, 1 }
 0x13e   :  { %v1581_v16 = vrot.slane %v1580_v55, 1  ;;  %v836_v26 = vmax.f32 %v772_v35, 0.0  ;;  %v1603_v33 = vmax.f32 %v1601_v29, %v1602_v50  ;;  %v1610_v17 = vmax.f32 %v1608_v6, %v1609_v51 }
 0x13f   :  { %v2602_v41 = vsel %vm2589_vm4, %v2469_v22, %v2601_v27  ;;  %v1193_v56 = vmax.f32 %v1191_v54, %v1192_v57  ;;  %v1575_v52 = vmax.f32 %v1573_v53, %v1574_v11  ;;  %v1200_v60 = vmax.f32 %v1198_v8, %v1199_v18  ;;  %v3636_v53 = vpop.f32.mrb[20].mxu1 }
 0x140   :  { %v2603_v31 = vsel %vm2591_vm5, %v2470_v14, %v2602_v41  ;;  %v1582_v34 = vmax.f32 %v1580_v55, %v1581_v16  ;;  %v964_v61 = vcombine.high %v836_v26, %v836_v26  ;;  %v1639_v28 = vsel %vm1050_vm2, %v836_v26, -inf }
 0x141   :  { %v2604_v37 = vsel %vm2593_vm6, %v3571_v7, %v2603_v31  ;;  %v667_v47 = vmul.f32 %v3400_v36, %v3459_v58  ;;  %v3029_v6 = vpack.c.bf16 %v1575_v52, %v1575_v52  ;;  %v699_v50 = vmul.f32 %v3400_v36, %v3461_v59  ;;  %v3634_v58 = vpop.f32.mrb[20].mxu0 }
 0x142   :  { %v2605_v29 = vsel %vm2595_vm7, %v3589_v23, %v2604_v37  ;;  %v3030_v27 = vpack.c.bf16 %v1582_v34, %v1582_v34  ;;  %v1194_v1 = vrot.slane %v1193_v56, 2  ;;  %v1640_v35 = vrot.slane %v1639_v28, 4 }
 0x143   :  { %v2606_v55 = vsel %vm2597_vm8, %v2473_v9, %v2605_v29  ;;  %v1646_v7 = vsel %vm1050_vm2, %v964_v61, -inf  ;;  %v3033_v51 = vpack.c.bf16 %v1603_v33, %v1603_v33  ;;  %v2533_v0 = vunpack.c.l.b16 %v3029_v6 }
 0x144   :  { %v2607_v62 = vsel %vm2599_vm9, %v2474_v19, %v2606_v55  ;;  %v2534_v54 = vunpack.c.l.b16 %v3030_v27  ;;  %v3034_v23 = vpack.c.bf16 %v1610_v17, %v1610_v17  ;;  %v1201_v8 = vrot.slane %v1200_v60, 2 }
 0x145   :  { %v2707_v57 = vpack.c.b16 %v2607_v62, %v2607_v62  ;;  %v1647_v22 = vrot.slane %v1646_v7, 4  ;;  %v2535_v59 = vunpack.c.l.b16 %v3031_v25  ;;  %v2658_v9 = vsel %vm2589_vm4, %v2533_v0, %v2657_v46 }
 0x146   :  { %v738_v14 = vadd.f32 %v3405_v38, %v667_v47  ;;  %v770_v18 = vadd.f32 %v3405_v38, %v699_v50  ;;  %v4213_v19 = vpack.c.bf16 %v3578_v30, %v3578_v30  ;;  %v2659_v16 = vsel %vm2591_vm5, %v2534_v54, %v2658_v9 }
 0x147   :  { %2739 = vst.msk [vmem:[%s4212_s4 + $0x4] sm:$0xf] %vm1050_vm2, %v2707_v57  ;;  %v1195_v26 = vmax.f32 %v1193_v56, %v1194_v1  ;;  %v1641_v24 = vmax.f32 %v1639_v28, %v1640_v35  ;;  %v2537_v25 = vunpack.c.l.b16 %v3033_v51  ;;  %v2660_v46 = vsel %vm2593_vm6, %v2535_v59, %v2659_v16  ;;  %v3657_v28 = vpop.f32.mrb[21].mxu0 }
 0x148   :  { %v2536_v11 = vunpack.c.l.b16 %v4213_v19  ;;  %v802_v33 = vmax.f32 %v738_v14, 0.0  ;;  %v834_v17 = vmax.f32 %v770_v18, 0.0  ;;  %v2538_v41 = vunpack.c.l.b16 %v3034_v23 }
 0x149   :  { %v1202_v52 = vmax.f32 %v1200_v60, %v1201_v8  ;;  %v1648_v30 = vmax.f32 %v1646_v7, %v1647_v22  ;;  %v1196_v29 = vrot.slane %v1195_v26, 1  ;;  %v1642_v56 = vrot.slane %v1641_v24, 2 }
 0x14a   :  { %v2661_v31 = vsel %vm2595_vm7, %v2536_v11, %v2660_v46  ;;  %v930_v37 = vcombine.high %v802_v33, %v802_v33  ;;  %v1163_v61 = vsel %vm1050_vm2, %v802_v33, -inf  ;;  %v962_v55 = vcombine.high %v834_v17, %v834_v17  ;;  %v3671_v46 = vpop.f32.mrb[21].mxu1 }
 0x14b   :  { %v2662_v34 = vsel %vm2597_vm8, %v2537_v25, %v2661_v31  ;;  %v1164_v27 = vrot.slane %v1163_v61, 4  ;;  %v1203_v1 = vrot.slane %v1202_v52, 1  ;;  %v1649_v35 = vrot.slane %v1648_v30, 2 }
 0x14c   :  { %v2663_v47 = vsel %vm2599_vm9, %v2538_v41, %v2662_v34  ;;  %v1170_v50 = vsel %vm1050_vm2, %v930_v37, -inf  ;;  %v1611_v7 = vsel %vm1050_vm2, %v834_v17, -inf  ;;  %v1618_v0 = vsel %vm1050_vm2, %v962_v55, -inf }
 0x14d   :  { %v2715_v6 = vpack.c.b16 %v2663_v47, %v2663_v47  ;;  %v1171_v60 = vrot.slane %v1170_v50, 4  ;;  %v1165_v51 = vmax.f32 %v1163_v61, %v1164_v27  ;;  %v1612_v62 = vrot.slane %v1611_v7, 4 }
 0x14e   :  { %v670_v54 = vmul.f32 %v3463_v4, %v3400_v36  ;;  %v1197_v23 = vmax.f32 %v1195_v26, %v1196_v29  ;;  %v1643_v57 = vmax.f32 %v1641_v24, %v1642_v56  ;;  %v1619_v22 = vrot.slane %v1618_v0, 4 }
 0x14f   :  { %2747 = vst.msk [vmem:[%s4212_s4 + $0x24] sm:$0xf] %vm1050_vm2, %v2715_v6  ;;  %v1172_v8 = vmax.f32 %v1170_v50, %v1171_v60  ;;  %v1166_v59 = vrot.slane %v1165_v51, 2  ;;  %v1613_v9 = vmax.f32 %v1611_v7, %v1612_v62  ;;  %v702_v18 = vmul.f32 %v3465_v5, %v3400_v36 }
 0x150   :  { %v741_v14 = vadd.f32 %v3405_v38, %v670_v54  ;;  %v1204_v19 = vmax.f32 %v1202_v52, %v1203_v1  ;;  %v1650_v11 = vmax.f32 %v1648_v30, %v1649_v35  ;;  %v1620_v25 = vmax.f32 %v1618_v0, %v1619_v22  ;;  %v3687_v22 = vpop.f32.mrb[22].mxu0 }
 0x151   :  { %v1173_v16 = vrot.slane %v1172_v8, 2  ;;  %v1167_v33 = vmax.f32 %v1165_v51, %v1166_v59  ;;  %v1614_v17 = vrot.slane %v1613_v9, 2  ;;  %v773_v26 = vadd.f32 %v3405_v38, %v702_v18  ;;  %v3684_v51 = vld [vmem:[%s4211_s3] ss:$0 sm:$0xff] }
 0x152   :  { %v805_v4 = vmax.f32 %v741_v14, 0.0  ;;  %v1644_v24 = vrot.slane %v1643_v57, 1  ;;  %v1621_v31 = vrot.slane %v1620_v25, 2  ;;  %v668_v34 = vmul.f32 %v3400_v36, %v3467_v12 }
 0x153   :  { %v1174_v41 = vmax.f32 %v1172_v8, %v1173_v16  ;;  %v1168_v37 = vrot.slane %v1167_v33, 1  ;;  %v1615_v61 = vmax.f32 %v1613_v9, %v1614_v17  ;;  %v837_v56 = vmax.f32 %v773_v26, 0.0 }
 0x154   :  { %v933_v5 = vcombine.high %v805_v4, %v805_v4  ;;  %v1205_v52 = vsel %vm1050_vm2, %v805_v4, -inf  ;;  %v1622_v47 = vmax.f32 %v1620_v25, %v1621_v31  ;;  %v2975_v6 = vpack.c.bf16 %v1197_v23, %v1197_v23 }
 0x155   :  { %v1175_v30 = vrot.slane %v1174_v41, 1  ;;  %v1206_v29 = vrot.slane %v1205_v52, 4  ;;  %v2976_v27 = vpack.c.bf16 %v1204_v19, %v1204_v19  ;;  %v1651_v50 = vrot.slane %v1650_v11, 1 }
 0x156   :  { %v1212_v38 = vsel %vm1050_vm2, %v933_v5, -inf  ;;  %v1616_v1 = vrot.slane %v1615_v61, 1  ;;  %v3678_v7 = vmax.f32 %v1643_v57, %v1644_v24  ;;  %v965_v36 = vcombine.high %v837_v56, %v837_v56 }
 0x157   :  { %v1176_v55 = vmax.f32 %v1174_v41, %v1175_v30  ;;  %v1207_v35 = vmax.f32 %v1205_v52, %v1206_v29  ;;  %v1213_v60 = vrot.slane %v1212_v38, 4  ;;  %v1653_v12 = vsel %vm1050_vm2, %v837_v56, -inf }
 0x158   :  { %v739_v62 = vadd.f32 %v3684_v51, %v668_v34  ;;  %v1169_v0 = vmax.f32 %v1167_v33, %v1168_v37  ;;  %v1623_v54 = vrot.slane %v1622_v47, 1  ;;  %v3689_v59 = vunpack.c.l.b16 %v2975_v6 }
 0x159   :  { %v1208_v23 = vrot.slane %v1207_v35, 2  ;;  %v1214_v8 = vmax.f32 %v1212_v38, %v1213_v60  ;;  %v3691_v57 = vmax.f32 %v1650_v11, %v1651_v50  ;;  %v1654_v9 = vrot.slane %v1653_v12, 4  ;;  %v3698_v11 = vpop.f32.mrb[22].mxu1 }
 0x15a   :  { %v1660_v14 = vsel %vm1050_vm2, %v965_v36, -inf  ;;  %v2972_v18 = vpack.c.bf16 %v1176_v55, %v1176_v55  ;;  %v1617_v19 = vmax.f32 %v1615_v61, %v1616_v1  ;;  %v3694_v17 = vunpack.c.l.b16 %v2976_v27 }
 0x15b   :  { %v1209_v16 = vmax.f32 %v1207_v35, %v1208_v23  ;;  %v1215_v25 = vrot.slane %v1214_v8, 2  ;;  %v1655_v4 = vmax.f32 %v1653_v12, %v1654_v9  ;;  %v1661_v33 = vrot.slane %v1660_v14, 4 }
 0x15c   :  { %v803_v26 = vmax.f32 %v739_v62, 0.0  ;;  %v2971_v41 = vpack.c.bf16 %v1169_v0, %v1169_v0  ;;  %v1624_v31 = vmax.f32 %v1622_v47, %v1623_v54  ;;  %v2476_v29 = vunpack.c.l.b16 %v2972_v18  ;;  %v3707_v47 = vld [vmem:[%s4210_s2] ss:$0 sm:$0xff]  ;;  %v3717_v18 = vpop.f32.mrb[23].mxu0 }
 0x15d   :  { %v1216_v34 = vmax.f32 %v1214_v8, %v1215_v25  ;;  %v1210_v37 = vrot.slane %v1209_v16, 1  ;;  %v1662_v5 = vmax.f32 %v1660_v14, %v1661_v33  ;;  %v3035_v56 = vpack.c.bf16 %v1617_v19, %v1617_v19 }
 0x15e   :  { %v931_v52 = vcombine.high %v803_v26, %v803_v26  ;;  %v1177_v61 = vsel %vm1050_vm2, %v803_v26, -inf  ;;  %v1656_v50 = vrot.slane %v1655_v4, 2  ;;  %v700_v55 = vmul.f32 %v3707_v47, %v3469_v13 }
 0x15f   :  { %v1178_v6 = vrot.slane %v1177_v61, 4  ;;  %v1217_v27 = vrot.slane %v1216_v34, 1  ;;  %v2475_v1 = vunpack.c.l.b16 %v2971_v41  ;;  %v3036_v35 = vpack.c.bf16 %v1624_v31, %v1624_v31 }
 0x160   :  { %v1184_v38 = vsel %vm1050_vm2, %v931_v52, -inf  ;;  %v1211_v12 = vmax.f32 %v1209_v16, %v1210_v37  ;;  %v1663_v62 = vrot.slane %v1662_v5, 2  ;;  %v771_v0 = vadd.f32 %v3684_v51, %v700_v55 }
 0x161   :  { %v1179_v60 = vmax.f32 %v1177_v61, %v1178_v6  ;;  %v1185_v36 = vrot.slane %v1184_v38, 4  ;;  %v673_v54 = vmul.f32 %v3707_v47, %v3481_v42  ;;  %v2608_v23 = vsel %vm2587_vm3, %v2476_v29, %v2475_v1  ;;  %v3723_v29 = vpop.f32.mrb[23].mxu1 }
 0x162   :  { %v3715_v8 = vunpack.c.l.b16 %v3035_v56  ;;  %v1218_v13 = vmax.f32 %v1216_v34, %v1217_v27  ;;  %v1657_v19 = vmax.f32 %v1655_v4, %v1656_v50  ;;  %v835_v25 = vmax.f32 %v771_v0, 0.0 }
 0x163   :  { %v1180_v9 = vrot.slane %v1179_v60, 2  ;;  %v1186_v14 = vmax.f32 %v1184_v38, %v1185_v36  ;;  %v744_v33 = vadd.f32 %v3684_v51, %v673_v54  ;;  %v2540_v16 = vunpack.c.l.b16 %v3036_v35 }
 0x164   :  { %v705_v31 = vmul.f32 %v3707_v47, %v3483_v43  ;;  %v2977_v42 = vpack.c.bf16 %v1211_v12, %v1211_v12  ;;  %v1664_v37 = vmax.f32 %v1662_v5, %v1663_v62  ;;  %v963_v52 = vcombine.high %v835_v25, %v835_v25 }
 0x165   :  { %v1181_v26 = vmax.f32 %v1179_v60, %v1180_v9  ;;  %v1187_v41 = vrot.slane %v1186_v14, 2  ;;  %v1625_v61 = vsel %vm1050_vm2, %v835_v25, -inf  ;;  %v808_v4 = vmax.f32 %v744_v33, 0.0 }
 0x166   :  { %v1626_v34 = vrot.slane %v1625_v61, 4  ;;  %v2978_v27 = vpack.c.bf16 %v1218_v13, %v1218_v13  ;;  %v1658_v50 = vrot.slane %v1657_v19, 1  ;;  %v1632_v38 = vsel %vm1050_vm2, %v963_v52, -inf }
 0x167   :  { %v1182_v56 = vrot.slane %v1181_v26, 1  ;;  %v1188_v6 = vmax.f32 %v1186_v14, %v1187_v41  ;;  %v776_v55 = vadd.f32 %v3684_v51, %v705_v31  ;;  %v1633_v60 = vrot.slane %v1632_v38, 4 }
 0x168   :  { %v1627_v43 = vmax.f32 %v1625_v61, %v1626_v34  ;;  %v1665_v5 = vrot.slane %v1664_v37, 1  ;;  %v936_v36 = vcombine.high %v808_v4, %v808_v4  ;;  %v1247_v12 = vsel %vm1050_vm2, %v808_v4, -inf }
 0x169   :  { %v1183_v1 = vmax.f32 %v1181_v26, %v1182_v56  ;;  %v1189_v35 = vrot.slane %v1188_v6, 1  ;;  %v840_v62 = vmax.f32 %v776_v55, 0.0  ;;  %v1634_v14 = vmax.f32 %v1632_v38, %v1633_v60 }
 0x16a   :  { %v1628_v9 = vrot.slane %v1627_v43, 2  ;;  %v1248_v25 = vrot.slane %v1247_v12, 4  ;;  %v1254_v13 = vsel %vm1050_vm2, %v936_v36, -inf  ;;  %v1659_v60 = vmax.f32 %v1657_v19, %v1658_v50 }
 0x16b   :  { %v1190_v0 = vmax.f32 %v1188_v6, %v1189_v35  ;;  %v2973_v54 = vpack.c.bf16 %v1183_v1, %v1183_v1  ;;  %v968_v33 = vcombine.high %v840_v62, %v840_v62  ;;  %v1695_v41 = vsel %vm1050_vm2, %v840_v62, -inf }
 0x16c   :  { %v1629_v52 = vmax.f32 %v1627_v43, %v1628_v9  ;;  %v1635_v61 = vrot.slane %v1634_v14, 2  ;;  %v1249_v56 = vmax.f32 %v1247_v12, %v1248_v25  ;;  %v1255_v34 = vrot.slane %v1254_v13, 4 }
 0x16d   :  { %v2974_v31 = vpack.c.bf16 %v1190_v0, %v1190_v0  ;;  %v2477_v26 = vunpack.c.l.b16 %v2973_v54  ;;  %v1696_v30 = vrot.slane %v1695_v41, 4  ;;  %v1702_v4 = vsel %vm1050_vm2, %v968_v33, -inf }
 0x16e   :  { %v1630_v1 = vrot.slane %v1629_v52, 1  ;;  %v1636_v38 = vmax.f32 %v1634_v14, %v1635_v61  ;;  %v2481_v35 = vunpack.c.l.b16 %v2977_v42  ;;  %v1250_v36 = vrot.slane %v1249_v56, 2  ;;  %v3745_v61 = vpop.f32.mrb[24].mxu1 }
 0x16f   :  { %v2478_v55 = vunpack.c.l.b16 %v2974_v31  ;;  %v2609_v6 = vsel %vm2589_vm4, %v2477_v26, %v2608_v23  ;;  %v1256_v24 = vmax.f32 %v1254_v13, %v1255_v34  ;;  %v1697_v43 = vmax.f32 %v1695_v41, %v1696_v30 }
 0x170   :  { %v1631_v0 = vmax.f32 %v1629_v52, %v1630_v1  ;;  %v1637_v54 = vrot.slane %v1636_v38, 1  ;;  %v2482_v9 = vunpack.c.l.b16 %v2978_v27  ;;  %v1666_v12 = vmax.f32 %v1664_v37, %v1665_v5  ;;  %v3743_v52 = vpop.f32.mrb[24].mxu0 }
 0x171   :  { %v2610_v62 = vsel %vm2591_vm5, %v2478_v55, %v2609_v6  ;;  %v1703_v33 = vrot.slane %v1702_v4, 4  ;;  %v671_v19 = vmul.f32 %v3707_v47, %v3486_v48  ;;  %v2664_v42 = vsel %vm2587_vm3, %v2540_v16, %v3715_v8 }
 0x172   :  { %v2611_v25 = vsel %vm2593_vm6, %v3689_v59, %v2610_v62  ;;  %v1638_v31 = vmax.f32 %v1636_v38, %v1637_v54  ;;  %v3037_v14 = vpack.c.bf16 %v1631_v0, %v1631_v0  ;;  %v1251_v30 = vmax.f32 %v1249_v56, %v1250_v36 }
 0x173   :  { %v2612_v23 = vsel %vm2595_vm7, %v3694_v17, %v2611_v25  ;;  %v1257_v27 = vrot.slane %v1256_v24, 2  ;;  %v1698_v13 = vrot.slane %v1697_v43, 2  ;;  %v3041_v41 = vpack.c.bf16 %v1659_v60, %v1659_v60  ;;  %v3759_v60 = vpop.f32.mrb[25].mxu0 }
 0x174   :  { %v2613_v50 = vsel %vm2597_vm8, %v2481_v35, %v2612_v23  ;;  %v3038_v5 = vpack.c.bf16 %v1638_v31, %v1638_v31  ;;  %v2541_v59 = vunpack.c.l.b16 %v3037_v14  ;;  %v3042_v26 = vpack.c.bf16 %v1666_v12, %v1666_v12 }
 0x175   :  { %v2614_v37 = vsel %vm2599_vm9, %v2482_v9, %v2613_v50  ;;  %v1704_v8 = vmax.f32 %v1702_v4, %v1703_v33  ;;  %v742_v16 = vadd.f32 %v3684_v51, %v671_v19  ;;  %v4214_v56 = vpack.c.bf16 %v3678_v7, %v3678_v7 }
 0x176   :  { %v2708_v17 = vpack.c.b16 %v2614_v37, %v2614_v37  ;;  %v2542_v48 = vunpack.c.l.b16 %v3038_v5  ;;  %v2665_v34 = vsel %vm2589_vm4, %v2541_v59, %v2664_v42  ;;  %v4215_v6 = vpack.c.bf16 %v3691_v57, %v3691_v57 }
 0x177   :  { %v2543_v55 = vunpack.c.l.b16 %v4214_v56  ;;  %v1252_v38 = vrot.slane %v1251_v30, 1  ;;  %v1258_v35 = vmax.f32 %v1256_v24, %v1257_v27  ;;  %v3762_v36 = vmax.f32 %v1697_v43, %v1698_v13 }
 0x178   :  { %v2544_v1 = vunpack.c.l.b16 %v4215_v6  ;;  %2740 = vst.msk [vmem:[%s4212_s4 + $0x8] sm:$0xf] %vm1050_vm2, %v2708_v17  ;;  %v2666_v4 = vsel %vm2591_vm5, %v2542_v48, %v2665_v34  ;;  %v806_v62 = vmax.f32 %v742_v16, 0.0  ;;  %v703_v7 = vmul.f32 %v3707_v47, %v3488_v49 }
 0x179   :  { %v2545_v0 = vunpack.c.l.b16 %v3041_v41  ;;  %v2546_v57 = vunpack.c.l.b16 %v3042_v26  ;;  %v2667_v54 = vsel %vm2593_vm6, %v2543_v55, %v2666_v4  ;;  %v674_v9 = vmul.f32 %v3707_v47, %v3494_v3 }
 0x17a   :  { %v2668_v12 = vsel %vm2595_vm7, %v2544_v1, %v2667_v54  ;;  %v1705_v24 = vrot.slane %v1704_v8, 2  ;;  %v934_v25 = vcombine.high %v806_v62, %v806_v62  ;;  %v1219_v33 = vsel %vm1050_vm2, %v806_v62, -inf }
 0x17b   :  { %v2669_v43 = vsel %vm2597_vm8, %v2545_v0, %v2668_v12  ;;  %v3772_v23 = vmax.f32 %v1251_v30, %v1252_v38  ;;  %v1259_v31 = vrot.slane %v1258_v35, 1  ;;  %v1220_v14 = vrot.slane %v1219_v33, 4  ;;  %v3794_v38 = vpop.f32.mrb[25].mxu1 }
 0x17c   :  { %v2670_v49 = vsel %vm2599_vm9, %v2546_v57, %v2669_v43  ;;  %v1700_v19 = vrot.slane %v3762_v36, 1  ;;  %v1226_v42 = vsel %vm1050_vm2, %v934_v25, -inf  ;;  %v774_v3 = vadd.f32 %v3684_v51, %v703_v7 }
 0x17d   :  { %v2716_v50 = vpack.c.b16 %v2670_v49, %v2670_v49  ;;  %v1221_v27 = vmax.f32 %v1219_v33, %v1220_v14  ;;  %v1227_v37 = vrot.slane %v1226_v42, 4  ;;  %v745_v5 = vadd.f32 %v3684_v51, %v674_v9 }
 0x17e   :  { %v3779_v59 = vmax.f32 %v1704_v8, %v1705_v24  ;;  %v838_v13 = vmax.f32 %v774_v3, 0.0  ;;  %v706_v30 = vmul.f32 %v3707_v47, %v3504_v20  ;;  %v672_v41 = vmul.f32 %v3707_v47, %v3509_v45 }
 0x17f   :  { %2748 = vst.msk [vmem:[%s4212_s4 + $0x28] sm:$0xf] %vm1050_vm2, %v2716_v50  ;;  %v3789_v26 = vmax.f32 %v1258_v35, %v1259_v31  ;;  %v1222_v17 = vrot.slane %v1221_v27, 2  ;;  %v1228_v48 = vmax.f32 %v1226_v42, %v1227_v37  ;;  %v809_v34 = vmax.f32 %v745_v5, 0.0 }
 0x180   :  { %v966_v16 = vcombine.high %v838_v13, %v838_v13  ;;  %v1667_v8 = vsel %vm1050_vm2, %v838_v13, -inf  ;;  %v777_v56 = vadd.f32 %v3684_v51, %v706_v30  ;;  %v743_v20 = vadd.f32 %v3684_v51, %v672_v41 }
 0x181   :  { %v1223_v55 = vmax.f32 %v1221_v27, %v1222_v17  ;;  %v1229_v6 = vrot.slane %v1228_v48, 2  ;;  %v1668_v45 = vrot.slane %v1667_v8, 4  ;;  %v937_v1 = vcombine.high %v809_v34, %v809_v34 }
 0x182   :  { %v2983_v35 = vpack.c.bf16 %v3772_v23, %v3772_v23  ;;  %v1674_v4 = vsel %vm1050_vm2, %v966_v16, -inf  ;;  %v1261_v62 = vsel %vm1050_vm2, %v809_v34, -inf  ;;  %v841_v7 = vmax.f32 %v777_v56, 0.0 }
 0x183   :  { %v1224_v0 = vrot.slane %v1223_v55, 1  ;;  %v1230_v57 = vmax.f32 %v1228_v48, %v1229_v6  ;;  %v1669_v54 = vmax.f32 %v1667_v8, %v1668_v45  ;;  %v1675_v9 = vrot.slane %v1674_v4, 4  ;;  %v3804_v6 = vpop.f32.mrb[26].mxu0 }
 0x184   :  { %v1262_v12 = vrot.slane %v1261_v62, 4  ;;  %v1268_v24 = vsel %vm1050_vm2, %v937_v1, -inf  ;;  %v969_v25 = vcombine.high %v841_v7, %v841_v7  ;;  %v1709_v33 = vsel %vm1050_vm2, %v841_v7, -inf }
 0x185   :  { %v1231_v43 = vrot.slane %v1230_v57, 1  ;;  %v1670_v31 = vrot.slane %v1669_v54, 2  ;;  %v1676_v14 = vmax.f32 %v1674_v4, %v1675_v9  ;;  %v807_v49 = vmax.f32 %v743_v20, 0.0 }
 0x186   :  { %v1263_v23 = vmax.f32 %v1261_v62, %v1262_v12  ;;  %v1269_v42 = vrot.slane %v1268_v24, 4  ;;  %v1710_v3 = vrot.slane %v1709_v33, 4  ;;  %v1716_v50 = vsel %vm1050_vm2, %v969_v25, -inf }
 0x187   :  { %v1225_v27 = vmax.f32 %v1223_v55, %v1224_v0  ;;  %v1232_v37 = vmax.f32 %v1230_v57, %v1231_v43  ;;  %v1671_v5 = vmax.f32 %v1669_v54, %v1670_v31  ;;  %v1677_v13 = vrot.slane %v1676_v14, 2 }
 0x188   :  { %v1264_v30 = vrot.slane %v1263_v23, 2  ;;  %v1270_v41 = vmax.f32 %v1268_v24, %v1269_v42  ;;  %v1711_v17 = vmax.f32 %v1709_v33, %v1710_v3  ;;  %v1717_v48 = vrot.slane %v1716_v50, 4 }
 0x189   :  { %v1707_v34 = vrot.slane %v3779_v59, 1  ;;  %v2980_v16 = vpack.c.bf16 %v1232_v37, %v1232_v37  ;;  %v1672_v8 = vrot.slane %v1671_v5, 1  ;;  %v1678_v56 = vmax.f32 %v1676_v14, %v1677_v13 }
 0x18a   :  { %v1265_v20 = vmax.f32 %v1263_v23, %v1264_v30  ;;  %v1271_v45 = vrot.slane %v1270_v41, 2  ;;  %v1712_v1 = vrot.slane %v1711_v17, 2  ;;  %v1718_v4 = vmax.f32 %v1716_v50, %v1717_v48 }
 0x18b   :  { %v3807_v55 = vmax.f32 %v3762_v36, %v1700_v19  ;;  %v1679_v62 = vrot.slane %v1678_v56, 1  ;;  %v935_v7 = vcombine.high %v807_v49, %v807_v49  ;;  %v2979_v0 = vpack.c.bf16 %v1225_v27, %v1225_v27 }
 0x18c   :  { %v1673_v57 = vmax.f32 %v1671_v5, %v1672_v8  ;;  %v1266_v54 = vrot.slane %v1265_v20, 1  ;;  %v1272_v9 = vmax.f32 %v1270_v41, %v1271_v45  ;;  %v2984_v12 = vpack.c.bf16 %v3789_v26, %v3789_v26 }
 0x18d   :  { %v3811_v24 = vunpack.c.l.b16 %v2983_v35  ;;  %v1233_v25 = vsel %vm1050_vm2, %v807_v49, -inf  ;;  %v704_v33 = vmul.f32 %v3707_v47, %v3513_v44  ;;  %v3817_v43 = vmax.f32 %v3779_v59, %v1707_v34  ;;  %v3822_v35 = vpop.f32.mrb[26].mxu1  ;;  %v3824_v44 = vpop.f32.mrb[27].mxu0 }
 0x18e   :  { %v2484_v36 = vunpack.c.l.b16 %v2980_v16  ;;  %v1713_v19 = vmax.f32 %v1711_v17, %v1712_v1  ;;  %v1719_v31 = vrot.slane %v1718_v4, 2  ;;  %v3047_v14 = vpack.c.bf16 %v3807_v55, %v3807_v55 }
 0x18f   :  { %v1680_v23 = vmax.f32 %v1678_v56, %v1679_v62  ;;  %v1234_v42 = vrot.slane %v1233_v25, 4  ;;  %v1240_v26 = vsel %vm1050_vm2, %v935_v7, -inf  ;;  %v2483_v3 = vunpack.c.l.b16 %v2979_v0 }
 0x190   :  { %v3043_v49 = vpack.c.bf16 %v1673_v57, %v1673_v57  ;;  %v1267_v50 = vmax.f32 %v1265_v20, %v1266_v54  ;;  %v1273_v27 = vrot.slane %v1272_v9, 1  ;;  %v3826_v59 = vunpack.c.l.b16 %v2984_v12 }
 0x191   :  { %v1235_v37 = vmax.f32 %v1233_v25, %v1234_v42  ;;  %v1241_v5 = vrot.slane %v1240_v26, 4  ;;  %v775_v13 = vadd.f32 %v3684_v51, %v704_v33  ;;  %v2615_v41 = vsel %vm2587_vm3, %v2484_v36, %v2483_v3  ;;  %v3840_v36 = vpop.f32.mrb[27].mxu1 }
 0x192   :  { %v1714_v17 = vrot.slane %v1713_v19, 1  ;;  %v1720_v48 = vmax.f32 %v1718_v4, %v1719_v31  ;;  %v3044_v34 = vpack.c.bf16 %v1680_v23, %v1680_v23  ;;  %v2547_v20 = vunpack.c.l.b16 %v3043_v49 }
 0x193   :  { %v1236_v16 = vrot.slane %v1235_v37, 2  ;;  %v1242_v8 = vmax.f32 %v1240_v26, %v1241_v5  ;;  %v839_v56 = vmax.f32 %v775_v13, 0.0  ;;  %v1274_v45 = vmax.f32 %v1272_v9, %v1273_v27 }
 0x194   :  { %v2985_v1 = vpack.c.bf16 %v1267_v50, %v1267_v50  ;;  %v677_v62 = vmul.f32 %v3707_v47, %v3541_v63  ;;  %v3835_v12 = vmax.f32 %v1713_v19, %v1714_v17  ;;  %v709_v33 = vmul.f32 %v3707_v47, %v3543_v2 }
 0x195   :  { %v1237_v7 = vmax.f32 %v1235_v37, %v1236_v16  ;;  %v1243_v0 = vrot.slane %v1242_v8, 2  ;;  %v967_v57 = vcombine.high %v839_v56, %v839_v56  ;;  %v1681_v54 = vsel %vm1050_vm2, %v839_v56, -inf }
 0x196   :  { %v1682_v25 = vrot.slane %v1681_v54, 4  ;;  %v748_v4 = vadd.f32 %v3684_v51, %v677_v62  ;;  %v1721_v9 = vrot.slane %v1720_v48, 1  ;;  %v780_v49 = vadd.f32 %v3684_v51, %v709_v33 }
 0x197   :  { %v1238_v31 = vrot.slane %v1237_v7, 1  ;;  %v1244_v23 = vmax.f32 %v1242_v8, %v1243_v0  ;;  %v1688_v63 = vsel %vm1050_vm2, %v967_v57, -inf  ;;  %v2548_v19 = vunpack.c.l.b16 %v3044_v34 }
 0x198   :  { %v1683_v42 = vmax.f32 %v1681_v54, %v1682_v25  ;;  %v1689_v26 = vrot.slane %v1688_v63, 4  ;;  %v812_v3 = vmax.f32 %v748_v4, 0.0  ;;  %v675_v37 = vmul.f32 %v3707_v47, %v3559_v40 }
 0x199   :  { %v1239_v50 = vmax.f32 %v1237_v7, %v1238_v31  ;;  %v1245_v27 = vrot.slane %v1244_v23, 1  ;;  %v844_v62 = vmax.f32 %v780_v49, 0.0  ;;  %v2986_v0 = vpack.c.bf16 %v1274_v45, %v1274_v45 }
 0x19a   :  { %v1684_v5 = vrot.slane %v1683_v42, 2  ;;  %v1690_v2 = vmax.f32 %v1688_v63, %v1689_v26  ;;  %v940_v13 = vcombine.high %v812_v3, %v812_v3  ;;  %v1303_v17 = vsel %vm1050_vm2, %v812_v3, -inf }
 0x19b   :  { %v1246_v16 = vmax.f32 %v1244_v23, %v1245_v27  ;;  %v2981_v8 = vpack.c.bf16 %v1239_v50, %v1239_v50  ;;  %v1304_v56 = vrot.slane %v1303_v17, 4  ;;  %v2489_v31 = vunpack.c.l.b16 %v2985_v1 }
 0x19c   :  { %v1685_v57 = vmax.f32 %v1683_v42, %v1684_v5  ;;  %v1691_v54 = vrot.slane %v1690_v2, 2  ;;  %v1310_v25 = vsel %vm1050_vm2, %v940_v13, -inf  ;;  %v1722_v40 = vmax.f32 %v1720_v48, %v1721_v9 }
 0x19d   :  { %v2982_v34 = vpack.c.bf16 %v1246_v16, %v1246_v16  ;;  %v2485_v7 = vunpack.c.l.b16 %v2981_v8  ;;  %v1305_v4 = vmax.f32 %v1303_v17, %v1304_v56  ;;  %v1311_v33 = vrot.slane %v1310_v25, 4 }
 0x19e   :  { %v1686_v30 = vrot.slane %v1685_v57, 1  ;;  %v1692_v63 = vmax.f32 %v1690_v2, %v1691_v54  ;;  %v972_v23 = vcombine.high %v844_v62, %v844_v62  ;;  %v746_v50 = vadd.f32 %v3684_v51, %v675_v37 }
 0x19f   :  { %v2486_v26 = vunpack.c.l.b16 %v2982_v34  ;;  %v2616_v3 = vsel %vm2589_vm4, %v2485_v7, %v2615_v41  ;;  %v1306_v42 = vrot.slane %v1305_v4, 2  ;;  %v1751_v27 = vsel %vm1050_vm2, %v844_v62, -inf }
 0x1a0   :  { %v1687_v49 = vmax.f32 %v1685_v57, %v1686_v30  ;;  %v1693_v45 = vrot.slane %v1692_v63, 1  ;;  %v2671_v5 = vsel %vm2587_vm3, %v2548_v19, %v2547_v20  ;;  %v2490_v13 = vunpack.c.l.b16 %v2986_v0  ;;  %v3860_v20 = vpop.f32.mrb[28].mxu0 }
 0x1a1   :  { %v2617_v17 = vsel %vm2591_vm5, %v2486_v26, %v2616_v3  ;;  %v1312_v1 = vmax.f32 %v1310_v25, %v1311_v33  ;;  %v707_v41 = vmul.f32 %v3707_v47, %v3574_v21  ;;  %v1752_v37 = vrot.slane %v1751_v27, 4 }
 0x1a2   :  { %v2618_v48 = vsel %vm2593_vm6, %v3811_v24, %v2617_v17  ;;  %v1694_v9 = vmax.f32 %v1692_v63, %v1693_v45  ;;  %v3045_v2 = vpack.c.bf16 %v1687_v49, %v1687_v49  ;;  %v1758_v16 = vsel %vm1050_vm2, %v972_v23, -inf }
 0x1a3   :  { %v2619_v30 = vsel %vm2595_vm7, %v3826_v59, %v2618_v48  ;;  %v810_v8 = vmax.f32 %v746_v50, 0.0  ;;  %v1307_v0 = vmax.f32 %v1305_v4, %v1306_v42  ;;  %v3049_v24 = vpack.c.bf16 %v3835_v12, %v3835_v12  ;;  %v3873_v12 = vpop.f32.mrb[28].mxu1 }
 0x1a4   :  { %v2620_v19 = vsel %vm2597_vm8, %v2489_v31, %v2619_v30  ;;  %v3046_v56 = vpack.c.bf16 %v1694_v9, %v1694_v9  ;;  %v2549_v62 = vunpack.c.l.b16 %v3045_v2  ;;  %v3050_v57 = vpack.c.bf16 %v1722_v40, %v1722_v40 }
 0x1a5   :  { %v2621_v21 = vsel %vm2599_vm9, %v2490_v13, %v2620_v19  ;;  %v1313_v54 = vrot.slane %v1312_v1, 2  ;;  %v1759_v7 = vrot.slane %v1758_v16, 4  ;;  %v2551_v33 = vunpack.c.l.b16 %v3047_v14  ;;  %v3882_v14 = vpop.f32.mrb[29].mxu0 }
 0x1a6   :  { %v2709_v25 = vpack.c.b16 %v2621_v21, %v2621_v21  ;;  %v2550_v59 = vunpack.c.l.b16 %v3046_v56  ;;  %v2672_v34 = vsel %vm2589_vm4, %v2549_v62, %v2671_v5  ;;  %v4216_v31 = vpack.c.bf16 %v3817_v43, %v3817_v43 }
 0x1a7   :  { %v1753_v63 = vmax.f32 %v1751_v27, %v1752_v37  ;;  %v938_v26 = vcombine.high %v810_v8, %v810_v8  ;;  %v1308_v3 = vrot.slane %v1307_v0, 1  ;;  %v1275_v23 = vsel %vm1050_vm2, %v810_v8, -inf }
 0x1a8   :  { %v2552_v4 = vunpack.c.l.b16 %v4216_v31  ;;  %2741 = vst.msk [vmem:[%s4212_s4 + $0xc] sm:$0xf] %vm1050_vm2, %v2709_v25  ;;  %v2673_v40 = vsel %vm2591_vm5, %v2550_v59, %v2672_v34  ;;  %v778_v55 = vadd.f32 %v3684_v51, %v707_v41  ;;  %v2553_v43 = vunpack.c.l.b16 %v3049_v24 }
 0x1a9   :  { %v2554_v50 = vunpack.c.l.b16 %v3050_v57  ;;  %v2674_v49 = vsel %vm2593_vm6, %v2551_v33, %v2673_v40  ;;  %v1314_v45 = vmax.f32 %v1312_v1, %v1313_v54  ;;  %v1760_v27 = vmax.f32 %v1758_v16, %v1759_v7  ;;  %v3902_v33 = vpop.f32.mrb[29].mxu1 }
 0x1aa   :  { %v2675_v42 = vsel %vm2595_vm7, %v2552_v4, %v2674_v49  ;;  %v1276_v5 = vrot.slane %v1275_v23, 4  ;;  %v1282_v13 = vsel %vm1050_vm2, %v938_v26, -inf  ;;  %v1754_v48 = vrot.slane %v1753_v63, 2 }
 0x1ab   :  { %v2676_v17 = vsel %vm2597_vm8, %v2553_v43, %v2675_v42  ;;  %v1283_v9 = vrot.slane %v1282_v13, 4  ;;  %v1309_v41 = vmax.f32 %v1307_v0, %v1308_v3  ;;  %v842_v37 = vmax.f32 %v778_v55, 0.0 }
 0x1ac   :  { %v2677_v2 = vsel %vm2599_vm9, %v2554_v50, %v2676_v17  ;;  %v1277_v30 = vmax.f32 %v1275_v23, %v1276_v5  ;;  %v1315_v19 = vrot.slane %v1314_v45, 1  ;;  %v678_v1 = vmul.f32 %v3707_v47, %v3591_v10 }
 0x1ad   :  { %v2717_v8 = vpack.c.b16 %v2677_v2, %v2677_v2  ;;  %v1284_v56 = vmax.f32 %v1282_v13, %v1283_v9  ;;  %v1761_v62 = vrot.slane %v1760_v27, 2  ;;  %v970_v24 = vcombine.high %v842_v37, %v842_v37 }
 0x1ae   :  { %v1278_v16 = vrot.slane %v1277_v30, 2  ;;  %v1723_v57 = vsel %vm1050_vm2, %v842_v37, -inf  ;;  %v1755_v21 = vmax.f32 %v1753_v63, %v1754_v48  ;;  %v749_v25 = vadd.f32 %v3684_v51, %v678_v1 }
 0x1af   :  { %2749 = vst.msk [vmem:[%s4212_s4 + $0x2c] sm:$0xf] %vm1050_vm2, %v2717_v8  ;;  %v1285_v0 = vrot.slane %v1284_v56, 2  ;;  %v1724_v54 = vrot.slane %v1723_v57, 4  ;;  %v1730_v34 = vsel %vm1050_vm2, %v970_v24, -inf  ;;  %v710_v10 = vmul.f32 %v3707_v47, %v3600_v39 }
 0x1b0   :  { %v1279_v59 = vmax.f32 %v1277_v30, %v1278_v16  ;;  %v676_v7 = vmul.f32 %v3707_v47, %v3605_v15  ;;  %v1731_v26 = vrot.slane %v1730_v34, 4  ;;  %v813_v40 = vmax.f32 %v749_v25, 0.0 }
 0x1b1   :  { %v1286_v31 = vmax.f32 %v1284_v56, %v1285_v0  ;;  %v1725_v4 = vmax.f32 %v1723_v57, %v1724_v54  ;;  %v1316_v63 = vmax.f32 %v1314_v45, %v1315_v19  ;;  %v2991_v3 = vpack.c.bf16 %v1309_v41, %v1309_v41 }
 0x1b2   :  { %v781_v23 = vadd.f32 %v3684_v51, %v710_v10  ;;  %v747_v55 = vadd.f32 %v3684_v51, %v676_v7  ;;  %v1732_v49 = vmax.f32 %v1730_v34, %v1731_v26  ;;  %v941_v42 = vcombine.high %v813_v40, %v813_v40  ;;  %v3912_v34 = vpop.f32.mrb[30].mxu0 }
 0x1b3   :  { %v1287_v43 = vrot.slane %v1286_v31, 1  ;;  %v1726_v50 = vrot.slane %v1725_v4, 2  ;;  %v1756_v39 = vrot.slane %v1755_v21, 1  ;;  %v1762_v5 = vmax.f32 %v1760_v27, %v1761_v62 }
 0x1b4   :  { %v1317_v15 = vsel %vm1050_vm2, %v813_v40, -inf  ;;  %v845_v13 = vmax.f32 %v781_v23, 0.0  ;;  %v1280_v17 = vrot.slane %v1279_v59, 1  ;;  %v1733_v9 = vrot.slane %v1732_v49, 2 }
 0x1b5   :  { %v1727_v48 = vmax.f32 %v1725_v4, %v1726_v50  ;;  %v1318_v2 = vrot.slane %v1317_v15, 4  ;;  %v1324_v45 = vsel %vm1050_vm2, %v941_v42, -inf  ;;  %v811_v37 = vmax.f32 %v747_v55, 0.0 }
 0x1b6   :  { %v973_v41 = vcombine.high %v845_v13, %v845_v13  ;;  %v1765_v30 = vsel %vm1050_vm2, %v845_v13, -inf  ;;  %v2992_v8 = vpack.c.bf16 %v1316_v63, %v1316_v63  ;;  %v1288_v19 = vmax.f32 %v1286_v31, %v1287_v43 }
 0x1b7   :  { %v1728_v56 = vrot.slane %v1727_v48, 1  ;;  %v1319_v1 = vmax.f32 %v1317_v15, %v1318_v2  ;;  %v1734_v16 = vmax.f32 %v1732_v49, %v1733_v9  ;;  %v1325_v24 = vrot.slane %v1324_v45, 4 }
 0x1b8   :  { %v1766_v27 = vrot.slane %v1765_v30, 4  ;;  %v1772_v62 = vsel %vm1050_vm2, %v973_v41, -inf  ;;  %v3910_v57 = vunpack.c.l.b16 %v2991_v3  ;;  %v1763_v0 = vrot.slane %v1762_v5, 1 }
 0x1b9   :  { %v1281_v54 = vmax.f32 %v1279_v59, %v1280_v17  ;;  %v1320_v25 = vrot.slane %v1319_v1, 2  ;;  %v1326_v10 = vmax.f32 %v1324_v45, %v1325_v24  ;;  %v1773_v4 = vrot.slane %v1772_v62, 4  ;;  %v3926_v45 = vpop.f32.mrb[30].mxu1 }
 0x1ba   :  { %v1767_v7 = vmax.f32 %v1765_v30, %v1766_v27  ;;  %v939_v26 = vcombine.high %v811_v37, %v811_v37  ;;  %v3914_v40 = vmax.f32 %v1755_v21, %v1756_v39  ;;  %v2988_v31 = vpack.c.bf16 %v1288_v19, %v1288_v19 }
 0x1bb   :  { %v1321_v63 = vmax.f32 %v1319_v1, %v1320_v25  ;;  %v708_v23 = vmul.f32 %v3707_v47, %v3612_v32  ;;  %v1729_v55 = vmax.f32 %v1727_v48, %v1728_v56  ;;  %v1735_v43 = vrot.slane %v1734_v16, 1 }
 0x1bc   :  { %v1327_v3 = vrot.slane %v1326_v10, 2  ;;  %v1289_v50 = vsel %vm1050_vm2, %v811_v37, -inf  ;;  %v3919_v59 = vunpack.c.l.b16 %v2992_v8  ;;  %v3921_v49 = vmax.f32 %v1762_v5, %v1763_v0  ;;  %v3929_v8 = vpop.f32.mrb[31].mxu0 }
 0x1bd   :  { %v2987_v42 = vpack.c.bf16 %v1281_v54, %v1281_v54  ;;  %v1290_v15 = vrot.slane %v1289_v50, 4  ;;  %v1322_v13 = vrot.slane %v1321_v63, 1  ;;  %v1768_v17 = vrot.slane %v1767_v7, 2 }
 0x1be   :  { %v1774_v21 = vmax.f32 %v1772_v62, %v1773_v4  ;;  %v1296_v39 = vsel %vm1050_vm2, %v939_v26, -inf  ;;  %v3055_v9 = vpack.c.bf16 %v3914_v40, %v3914_v40  ;;  %v2492_v32 = vunpack.c.l.b16 %v2988_v31 }
 0x1bf   :  { %v1291_v48 = vmax.f32 %v1289_v50, %v1290_v15  ;;  %v1297_v2 = vrot.slane %v1296_v39, 4  ;;  %v1736_v41 = vmax.f32 %v1734_v16, %v1735_v43  ;;  %v3051_v30 = vpack.c.bf16 %v1729_v55, %v1729_v55 }
 0x1c0   :  { %v1328_v37 = vmax.f32 %v1326_v10, %v1327_v3  ;;  %v779_v5 = vadd.f32 %v3684_v51, %v708_v23  ;;  %v3056_v19 = vpack.c.bf16 %v3921_v49, %v3921_v49  ;;  %v2491_v56 = vunpack.c.l.b16 %v2987_v42 }
 0x1c1   :  { %v1292_v1 = vrot.slane %v1291_v48, 2  ;;  %v1298_v24 = vmax.f32 %v1296_v39, %v1297_v2  ;;  %v1323_v27 = vmax.f32 %v1321_v63, %v1322_v13  ;;  %v1769_v62 = vmax.f32 %v1767_v7, %v1768_v17  ;;  %v3938_v17 = vpop.f32.mrb[31].mxu1 }
 0x1c2   :  { %v1775_v0 = vrot.slane %v1774_v21, 2  ;;  %v843_v54 = vmax.f32 %v779_v5, 0.0  ;;  %v2622_v25 = vsel %vm2587_vm3, %v2492_v32, %v2491_v56  ;;  %v681_v10 = vmul.f32 %v3707_v47, %v3634_v58 }
 0x1c3   :  { %v1293_v4 = vmax.f32 %v1291_v48, %v1292_v1  ;;  %v1299_v16 = vrot.slane %v1298_v24, 2  ;;  %v3052_v26 = vpack.c.bf16 %v1736_v41, %v1736_v41  ;;  %v2555_v31 = vunpack.c.l.b16 %v3051_v30 }
 0x1c4   :  { %v1329_v23 = vrot.slane %v1328_v37, 1  ;;  %v971_v55 = vcombine.high %v843_v54, %v843_v54  ;;  %v1737_v50 = vsel %vm1050_vm2, %v843_v54, -inf  ;;  %v752_v63 = vadd.f32 %v3684_v51, %v681_v10 }
 0x1c5   :  { %v1294_v43 = vrot.slane %v1293_v4, 1  ;;  %v1300_v3 = vmax.f32 %v1298_v24, %v1299_v16  ;;  %v2993_v7 = vpack.c.bf16 %v1323_v27, %v1323_v27  ;;  %v1770_v42 = vrot.slane %v1769_v62, 1 }
 0x1c6   :  { %v1776_v15 = vmax.f32 %v1774_v21, %v1775_v0  ;;  %v1738_v13 = vrot.slane %v1737_v50, 4  ;;  %v1744_v58 = vsel %vm1050_vm2, %v971_v55, -inf  ;;  %v816_v48 = vmax.f32 %v752_v63, 0.0 }
 0x1c7   :  { %v1295_v39 = vmax.f32 %v1293_v4, %v1294_v43  ;;  %v1301_v32 = vrot.slane %v1300_v3, 1  ;;  %v1330_v2 = vmax.f32 %v1328_v37, %v1329_v23  ;;  %v1745_v30 = vrot.slane %v1744_v58, 4 }
 0x1c8   :  { %v1739_v41 = vmax.f32 %v1737_v50, %v1738_v13  ;;  %v713_v5 = vmul.f32 %v3707_v47, %v3636_v53  ;;  %v944_v24 = vcombine.high %v816_v48, %v816_v48  ;;  %v1359_v27 = vsel %vm1050_vm2, %v816_v48, -inf }
 0x1c9   :  { %v1302_v56 = vmax.f32 %v1300_v3, %v1301_v32  ;;  %v2989_v1 = vpack.c.bf16 %v1295_v39, %v1295_v39  ;;  %v1746_v0 = vmax.f32 %v1744_v58, %v1745_v30  ;;  %v1360_v54 = vrot.slane %v1359_v27, 4 }
 0x1ca   :  { %v1740_v21 = vrot.slane %v1739_v41, 2  ;;  %v784_v4 = vadd.f32 %v3684_v51, %v713_v5  ;;  %v1366_v55 = vsel %vm1050_vm2, %v944_v24, -inf  ;;  %v679_v37 = vmul.f32 %v3707_v47, %v3657_v28 }
 0x1cb   :  { %v2990_v16 = vpack.c.bf16 %v1302_v56, %v1302_v56  ;;  %v2493_v10 = vunpack.c.l.b16 %v2989_v1  ;;  %v2994_v23 = vpack.c.bf16 %v1330_v2, %v1330_v2  ;;  %v1777_v43 = vrot.slane %v1776_v15, 1 }
 0x1cc   :  { %v1741_v53 = vmax.f32 %v1739_v41, %v1740_v21  ;;  %v1747_v3 = vrot.slane %v1746_v0, 2  ;;  %v1367_v13 = vrot.slane %v1366_v55, 4  ;;  %v750_v39 = vadd.f32 %v3684_v51, %v679_v37 }
 0x1cd   :  { %v2494_v50 = vunpack.c.l.b16 %v2990_v16  ;;  %v2623_v63 = vsel %vm2589_vm4, %v2493_v10, %v2622_v25  ;;  %v2556_v32 = vunpack.c.l.b16 %v3052_v26  ;;  %v848_v30 = vmax.f32 %v784_v4, 0.0 }
 0x1ce   :  { %v1742_v58 = vrot.slane %v1741_v53, 1  ;;  %v1748_v48 = vmax.f32 %v1746_v0, %v1747_v3  ;;  %v2497_v5 = vunpack.c.l.b16 %v2993_v7  ;;  %v1771_v56 = vmax.f32 %v1769_v62, %v1770_v42 }
 0x1cf   :  { %v2624_v1 = vsel %vm2591_vm5, %v2494_v50, %v2623_v63  ;;  %v1361_v24 = vmax.f32 %v1359_v27, %v1360_v54  ;;  %v1778_v28 = vmax.f32 %v1776_v15, %v1777_v43  ;;  %v2498_v16 = vunpack.c.l.b16 %v2994_v23 }
 0x1d0   :  { %v2625_v2 = vsel %vm2593_vm6, %v3910_v57, %v2624_v1  ;;  %v1743_v41 = vmax.f32 %v1741_v53, %v1742_v58  ;;  %v1749_v21 = vrot.slane %v1748_v48, 1  ;;  %v1368_v51 = vmax.f32 %v1366_v55, %v1367_v13 }
 0x1d1   :  { %v2626_v25 = vsel %vm2595_vm7, %v3919_v59, %v2625_v2  ;;  %v814_v26 = vmax.f32 %v750_v39, 0.0  ;;  %v976_v62 = vcombine.high %v848_v30, %v848_v30  ;;  %v2678_v42 = vsel %vm2587_vm3, %v2556_v32, %v2555_v31 }
 0x1d2   :  { %v2627_v0 = vsel %vm2597_vm8, %v2497_v5, %v2626_v25  ;;  %v1750_v4 = vmax.f32 %v1748_v48, %v1749_v21  ;;  %v3053_v7 = vpack.c.bf16 %v1743_v41, %v1743_v41  ;;  %v3057_v27 = vpack.c.bf16 %v1771_v56, %v1771_v56 }
 0x1d3   :  { %v2628_v15 = vsel %vm2599_vm9, %v2498_v16, %v2627_v0  ;;  %v1362_v54 = vrot.slane %v1361_v24, 2  ;;  %v1807_v23 = vsel %vm1050_vm2, %v848_v30, -inf  ;;  %v2559_v59 = vunpack.c.l.b16 %v3055_v9 }
 0x1d4   :  { %v2710_v57 = vpack.c.b16 %v2628_v15, %v2628_v15  ;;  %v3054_v10 = vpack.c.bf16 %v1750_v4, %v1750_v4  ;;  %v2557_v37 = vunpack.c.l.b16 %v3053_v7  ;;  %v3058_v55 = vpack.c.bf16 %v1778_v28, %v1778_v28  ;;  %v3989_v7 = vld [vmem:[%s4210_s2] ss:$0 sm:$0xff] }
 0x1d5   :  { %v1369_v43 = vrot.slane %v1368_v51, 2  ;;  %v942_v53 = vcombine.high %v814_v26, %v814_v26  ;;  %v1814_v50 = vsel %vm1050_vm2, %v976_v62, -inf  ;;  %v1331_v63 = vsel %vm1050_vm2, %v814_v26, -inf }
 0x1d6   :  { %2742 = vst.msk [vmem:[%s4212_s4 + $0x10] sm:$0xf] %vm1050_vm2, %v2710_v57  ;;  %v2558_v31 = vunpack.c.l.b16 %v3054_v10  ;;  %v2679_v3 = vsel %vm2589_vm4, %v2557_v37, %v2678_v42  ;;  %v2560_v40 = vunpack.c.l.b16 %v3056_v19  ;;  %v1363_v9 = vmax.f32 %v1361_v24, %v1362_v54  ;;  %v3981_v24 = vld [vmem:[%s4211_s3] ss:$0 sm:$0xff] }
 0x1d7   :  { %v1808_v13 = vrot.slane %v1807_v23, 4  ;;  %v1332_v39 = vrot.slane %v1331_v63, 4  ;;  %v2561_v32 = vunpack.c.l.b16 %v3057_v27  ;;  %v1338_v48 = vsel %vm1050_vm2, %v942_v53, -inf }
 0x1d8   :  { %v2680_v58 = vsel %vm2591_vm5, %v2558_v31, %v2679_v3  ;;  %v711_v30 = vmul.f32 %v3707_v47, %v3671_v46  ;;  %v2562_v5 = vunpack.c.l.b16 %v3058_v55  ;;  %v1370_v1 = vmax.f32 %v1368_v51, %v1369_v43 }
 0x1d9   :  { %v2681_v56 = vsel %vm2593_vm6, %v2559_v59, %v2680_v58  ;;  %v1815_v28 = vrot.slane %v1814_v50, 4  ;;  %v1333_v49 = vmax.f32 %v1331_v63, %v1332_v39  ;;  %v1339_v19 = vrot.slane %v1338_v48, 4 }
 0x1da   :  { %v2682_v2 = vsel %vm2595_vm7, %v2560_v40, %v2681_v56  ;;  %v782_v41 = vadd.f32 %v3981_v24, %v711_v30  ;;  %v1364_v16 = vrot.slane %v1363_v9, 1  ;;  %v1809_v46 = vmax.f32 %v1807_v23, %v1808_v13 }
 0x1db   :  { %v2683_v21 = vsel %vm2597_vm8, %v2561_v32, %v2682_v2  ;;  %v1334_v25 = vrot.slane %v1333_v49, 2  ;;  %v1340_v51 = vmax.f32 %v1338_v48, %v1339_v19  ;;  %v1371_v4 = vrot.slane %v1370_v1, 1 }
 0x1dc   :  { %v2684_v47 = vsel %vm2599_vm9, %v2562_v5, %v2683_v21  ;;  %v846_v26 = vmax.f32 %v782_v41, 0.0  ;;  %v682_v62 = vmul.f32 %v3989_v7, %v3687_v22  ;;  %v1816_v42 = vmax.f32 %v1814_v50, %v1815_v28 }
 0x1dd   :  { %v2718_v0 = vpack.c.b16 %v2684_v47, %v2684_v47  ;;  %v1341_v27 = vrot.slane %v1340_v51, 2  ;;  %v1365_v57 = vmax.f32 %v1363_v9, %v1364_v16  ;;  %v1810_v10 = vrot.slane %v1809_v46, 2 }
 0x1de   :  { %v974_v15 = vcombine.high %v846_v26, %v846_v26  ;;  %v1779_v54 = vsel %vm1050_vm2, %v846_v26, -inf  ;;  %v753_v23 = vadd.f32 %v3981_v24, %v682_v62  ;;  %v1335_v59 = vmax.f32 %v1333_v49, %v1334_v25 }
 0x1df   :  { %2750 = vst.msk [vmem:[%s4212_s4 + $0x30] sm:$0xf] %vm1050_vm2, %v2718_v0  ;;  %v1780_v37 = vrot.slane %v1779_v54, 4  ;;  %v1342_v55 = vmax.f32 %v1340_v51, %v1341_v27  ;;  %v714_v22 = vmul.f32 %v3989_v7, %v3698_v11  ;;  %v1372_v53 = vmax.f32 %v1370_v1, %v1371_v4 }
 0x1e0   :  { %v1786_v43 = vsel %vm1050_vm2, %v974_v15, -inf  ;;  %v817_v50 = vmax.f32 %v753_v23, 0.0  ;;  %v1817_v63 = vrot.slane %v1816_v42, 2  ;;  %v680_v9 = vmul.f32 %v3989_v7, %v3717_v18 }
 0x1e1   :  { %v1781_v31 = vmax.f32 %v1779_v54, %v1780_v37  ;;  %v1787_v3 = vrot.slane %v1786_v43, 4  ;;  %v1343_v40 = vrot.slane %v1342_v55, 1  ;;  %v785_v13 = vadd.f32 %v3981_v24, %v714_v22 }
 0x1e2   :  { %v945_v58 = vcombine.high %v817_v50, %v817_v50  ;;  %v1373_v48 = vsel %vm1050_vm2, %v817_v50, -inf  ;;  %v1811_v30 = vmax.f32 %v1809_v46, %v1810_v10  ;;  %v1336_v5 = vrot.slane %v1335_v59, 1 }
 0x1e3   :  { %v1782_v39 = vrot.slane %v1781_v31, 2  ;;  %v1788_v32 = vmax.f32 %v1786_v43, %v1787_v3  ;;  %v1374_v56 = vrot.slane %v1373_v48, 4  ;;  %v849_v11 = vmax.f32 %v785_v13, 0.0 }
 0x1e4   :  { %v1380_v2 = vsel %vm1050_vm2, %v945_v58, -inf  ;;  %v751_v49 = vadd.f32 %v3981_v24, %v680_v9  ;;  %v2999_v19 = vpack.c.bf16 %v1365_v57, %v1365_v57  ;;  %v1344_v41 = vmax.f32 %v1342_v55, %v1343_v40 }
 0x1e5   :  { %v1783_v1 = vmax.f32 %v1781_v31, %v1782_v39  ;;  %v1789_v28 = vrot.slane %v1788_v32, 2  ;;  %v1375_v21 = vmax.f32 %v1373_v48, %v1374_v56  ;;  %v1381_v16 = vrot.slane %v1380_v2, 4 }
 0x1e6   :  { %v1818_v18 = vmax.f32 %v1816_v42, %v1817_v63  ;;  %v977_v25 = vcombine.high %v849_v11, %v849_v11  ;;  %v1821_v51 = vsel %vm1050_vm2, %v849_v11, -inf  ;;  %v1337_v26 = vmax.f32 %v1335_v59, %v1336_v5 }
 0x1e7   :  { %v1790_v47 = vmax.f32 %v1788_v32, %v1789_v28  ;;  %v1784_v46 = vrot.slane %v1783_v1, 1  ;;  %v1376_v0 = vrot.slane %v1375_v21, 2  ;;  %v1382_v4 = vmax.f32 %v1380_v2, %v1381_v16 }
 0x1e8   :  { %v3000_v62 = vpack.c.bf16 %v1372_v53, %v1372_v53  ;;  %v1812_v27 = vrot.slane %v1811_v30, 1  ;;  %v1822_v15 = vrot.slane %v1821_v51, 4  ;;  %v815_v54 = vmax.f32 %v751_v49, 0.0 }
 0x1e9   :  { %v4009_v10 = vunpack.c.l.b16 %v2999_v19  ;;  %v2996_v37 = vpack.c.bf16 %v1344_v41, %v1344_v41  ;;  %v1791_v57 = vrot.slane %v1790_v47, 1  ;;  %v1819_v23 = vrot.slane %v1818_v18, 1 }
 0x1ea   :  { %v1383_v55 = vrot.slane %v1382_v4, 2  ;;  %v1828_v42 = vsel %vm1050_vm2, %v977_v25, -inf  ;;  %v943_v43 = vcombine.high %v815_v54, %v815_v54  ;;  %v2995_v22 = vpack.c.bf16 %v1337_v26, %v1337_v26 }
 0x1eb   :  { %v1785_v31 = vmax.f32 %v1783_v1, %v1784_v46  ;;  %v1377_v3 = vmax.f32 %v1375_v21, %v1376_v0  ;;  %v1345_v59 = vsel %vm1050_vm2, %v815_v54, -inf  ;;  %v4013_v50 = vunpack.c.l.b16 %v3000_v62 }
 0x1ec   :  { %v4015_v53 = vmax.f32 %v1811_v30, %v1812_v27  ;;  %v1823_v63 = vmax.f32 %v1821_v51, %v1822_v15  ;;  %v1346_v40 = vrot.slane %v1345_v59, 4  ;;  %v2500_v13 = vunpack.c.l.b16 %v2996_v37 }
 0x1ed   :  { %v1792_v9 = vmax.f32 %v1790_v47, %v1791_v57  ;;  %v1829_v39 = vrot.slane %v1828_v42, 4  ;;  %v1352_v32 = vsel %vm1050_vm2, %v943_v43, -inf  ;;  %v4018_v58 = vmax.f32 %v1818_v18, %v1819_v23 }
 0x1ee   :  { %v1384_v48 = vmax.f32 %v1382_v4, %v1383_v55  ;;  %v1347_v5 = vmax.f32 %v1345_v59, %v1346_v40  ;;  %v1353_v56 = vrot.slane %v1352_v32, 4  ;;  %v2499_v11 = vunpack.c.l.b16 %v2995_v22 }
 0x1ef   :  { %v3059_v1 = vpack.c.bf16 %v1785_v31, %v1785_v31  ;;  %v1378_v28 = vrot.slane %v1377_v3, 1  ;;  %v712_v2 = vmul.f32 %v3989_v7, %v3723_v29  ;;  %v3063_v30 = vpack.c.bf16 %v4015_v53, %v4015_v53 }
 0x1f0   :  { %v1824_v49 = vrot.slane %v1823_v63, 2  ;;  %v1348_v19 = vrot.slane %v1347_v5, 2  ;;  %v1354_v41 = vmax.f32 %v1352_v32, %v1353_v56  ;;  %v2629_v21 = vsel %vm2587_vm3, %v2500_v13, %v2499_v11 }
 0x1f1   :  { %v3060_v16 = vpack.c.bf16 %v1792_v9, %v1792_v9  ;;  %v1830_v18 = vmax.f32 %v1828_v42, %v1829_v39  ;;  %v783_v47 = vadd.f32 %v3981_v24, %v712_v2  ;;  %v1385_v25 = vrot.slane %v1384_v48, 1 }
 0x1f2   :  { %v1349_v51 = vmax.f32 %v1347_v5, %v1348_v19  ;;  %v1355_v26 = vrot.slane %v1354_v41, 2  ;;  %v685_v46 = vmul.f32 %v3989_v7, %v3743_v52  ;;  %v2563_v0 = vunpack.c.l.b16 %v3059_v1 }
 0x1f3   :  { %v1379_v29 = vmax.f32 %v1377_v3, %v1378_v28  ;;  %v847_v4 = vmax.f32 %v783_v47, 0.0  ;;  %v717_v62 = vmul.f32 %v3989_v7, %v3745_v61  ;;  %v1825_v27 = vmax.f32 %v1823_v63, %v1824_v49 }
 0x1f4   :  { %v1350_v15 = vrot.slane %v1349_v51, 1  ;;  %v1356_v54 = vmax.f32 %v1354_v41, %v1355_v26  ;;  %v756_v37 = vadd.f32 %v3981_v24, %v685_v46  ;;  %v1831_v57 = vrot.slane %v1830_v18, 2 }
 0x1f5   :  { %v975_v23 = vcombine.high %v847_v4, %v847_v4  ;;  %v1793_v55 = vsel %vm1050_vm2, %v847_v4, -inf  ;;  %v788_v42 = vadd.f32 %v3981_v24, %v717_v62  ;;  %v1386_v43 = vmax.f32 %v1384_v48, %v1385_v25 }
 0x1f6   :  { %v1351_v22 = vmax.f32 %v1349_v51, %v1350_v15  ;;  %v1357_v52 = vrot.slane %v1356_v54, 1  ;;  %v1794_v31 = vrot.slane %v1793_v55, 4  ;;  %v2564_v3 = vunpack.c.l.b16 %v3060_v16 }
 0x1f7   :  { %v1800_v59 = vsel %vm1050_vm2, %v975_v23, -inf  ;;  %v820_v40 = vmax.f32 %v756_v37, 0.0  ;;  %v852_v61 = vmax.f32 %v788_v42, 0.0  ;;  %v3001_v63 = vpack.c.bf16 %v1379_v29, %v1379_v29 }
 0x1f8   :  { %v1358_v13 = vmax.f32 %v1356_v54, %v1357_v52  ;;  %v2997_v9 = vpack.c.bf16 %v1351_v22, %v1351_v22  ;;  %v1795_v39 = vmax.f32 %v1793_v55, %v1794_v31  ;;  %v1832_v32 = vmax.f32 %v1830_v18, %v1831_v57 }
 0x1f9   :  { %v1801_v5 = vrot.slane %v1800_v59, 4  ;;  %v948_v56 = vcombine.high %v820_v40, %v820_v40  ;;  %v1415_v11 = vsel %vm1050_vm2, %v820_v40, -inf  ;;  %v3002_v1 = vpack.c.bf16 %v1386_v43, %v1386_v43 }
 0x1fa   :  { %v2998_v28 = vpack.c.bf16 %v1358_v13, %v1358_v13  ;;  %v2501_v48 = vunpack.c.l.b16 %v2997_v9  ;;  %v1796_v2 = vrot.slane %v1795_v39, 2  ;;  %v1826_v49 = vrot.slane %v1825_v27, 1 }
 0x1fb   :  { %v1802_v19 = vmax.f32 %v1800_v59, %v1801_v5  ;;  %v1416_v41 = vrot.slane %v1415_v11, 4  ;;  %v980_v16 = vcombine.high %v852_v61, %v852_v61  ;;  %v683_v26 = vmul.f32 %v3989_v7, %v3759_v60 }
 0x1fc   :  { %v2502_v47 = vunpack.c.l.b16 %v2998_v28  ;;  %v2630_v25 = vsel %vm2589_vm4, %v2501_v48, %v2629_v21  ;;  %v1797_v51 = vmax.f32 %v1795_v39, %v1796_v2  ;;  %v2505_v18 = vunpack.c.l.b16 %v3001_v63 }
 0x1fd   :  { %v1833_v46 = vrot.slane %v1832_v32, 1  ;;  %v1803_v29 = vrot.slane %v1802_v19, 2  ;;  %v1422_v4 = vsel %vm1050_vm2, %v948_v56, -inf  ;;  %v2506_v62 = vunpack.c.l.b16 %v3002_v1 }
 0x1fe   :  { %v2631_v15 = vsel %vm2591_vm5, %v2502_v47, %v2630_v25  ;;  %v1798_v54 = vrot.slane %v1797_v51, 1  ;;  %v1863_v37 = vsel %vm1050_vm2, %v852_v61, -inf  ;;  %v1417_v21 = vmax.f32 %v1415_v11, %v1416_v41 }
 0x1ff   :  { %v2632_v57 = vsel %vm2593_vm6, %v4009_v10, %v2631_v15  ;;  %v1804_v23 = vmax.f32 %v1802_v19, %v1803_v29  ;;  %v1870_v55 = vsel %vm1050_vm2, %v980_v16, -inf  ;;  %v1423_v43 = vrot.slane %v1422_v4, 4 }
 0x200   :  { %v2633_v60 = vsel %vm2595_vm7, %v4013_v50, %v2632_v57  ;;  %v1799_v42 = vmax.f32 %v1797_v51, %v1798_v54  ;;  %v754_v22 = vadd.f32 %v3981_v24, %v683_v26  ;;  %v1827_v52 = vmax.f32 %v1825_v27, %v1826_v49 }
 0x201   :  { %v1834_v31 = vmax.f32 %v1832_v32, %v1833_v46  ;;  %v2634_v59 = vsel %vm2597_vm8, %v2505_v18, %v2633_v60  ;;  %v1805_v40 = vrot.slane %v1804_v23, 1  ;;  %v2685_v61 = vsel %vm2587_vm3, %v2564_v3, %v2563_v0 }
 0x202   :  { %v2635_v10 = vsel %vm2599_vm9, %v2506_v62, %v2634_v59  ;;  %v3061_v63 = vpack.c.bf16 %v1799_v42, %v1799_v42  ;;  %v1864_v13 = vrot.slane %v1863_v37, 4  ;;  %v1418_v5 = vrot.slane %v1417_v21, 2 }
 0x203   :  { %v2711_v9 = vpack.c.b16 %v2635_v10, %v2635_v10  ;;  %v1806_v39 = vmax.f32 %v1804_v23, %v1805_v40  ;;  %v1871_v56 = vrot.slane %v1870_v55, 4  ;;  %v3064_v50 = vpack.c.bf16 %v4018_v58, %v4018_v58 }
 0x204   :  { %v2565_v11 = vunpack.c.l.b16 %v3061_v63  ;;  %v1424_v1 = vmax.f32 %v1422_v4, %v1423_v43  ;;  %v818_v27 = vmax.f32 %v754_v22, 0.0  ;;  %v2567_v32 = vunpack.c.l.b16 %v3063_v30 }
 0x205   :  { %v3065_v28 = vpack.c.bf16 %v1827_v52, %v1827_v52  ;;  %v3066_v0 = vpack.c.bf16 %v1834_v31, %v1834_v31  ;;  %2743 = vst.msk [vmem:[%s4212_s4 + $0x14] sm:$0xf] %vm1050_vm2, %v2711_v9  ;;  %v3062_v3 = vpack.c.bf16 %v1806_v39, %v1806_v39  ;;  %v1865_v2 = vmax.f32 %v1863_v37, %v1864_v13 }
 0x206   :  { %v2686_v48 = vsel %vm2589_vm4, %v2565_v11, %v2685_v61  ;;  %v946_v49 = vcombine.high %v818_v27, %v818_v27  ;;  %v715_v58 = vmul.f32 %v3989_v7, %v3794_v38  ;;  %v1419_v41 = vmax.f32 %v1417_v21, %v1418_v5 }
 0x207   :  { %v2566_v19 = vunpack.c.l.b16 %v3062_v3  ;;  %v1872_v16 = vmax.f32 %v1870_v55, %v1871_v56  ;;  %v1387_v53 = vsel %vm1050_vm2, %v818_v27, -inf  ;;  %v2568_v30 = vunpack.c.l.b16 %v3064_v50 }
 0x208   :  { %v1425_v47 = vrot.slane %v1424_v1, 2  ;;  %v1388_v25 = vrot.slane %v1387_v53, 4  ;;  %v1394_v51 = vsel %vm1050_vm2, %v946_v49, -inf  ;;  %v2569_v26 = vunpack.c.l.b16 %v3065_v28 }
 0x209   :  { %v2570_v18 = vunpack.c.l.b16 %v3066_v0  ;;  %v2687_v46 = vsel %vm2591_vm5, %v2566_v19, %v2686_v48  ;;  %v1395_v29 = vrot.slane %v1394_v51, 4  ;;  %v1866_v62 = vrot.slane %v1865_v2, 2 }
 0x20a   :  { %v2688_v4 = vsel %vm2593_vm6, %v2567_v32, %v2687_v46  ;;  %v1389_v15 = vmax.f32 %v1387_v53, %v1388_v25  ;;  %v786_v38 = vadd.f32 %v3981_v24, %v715_v58  ;;  %v1420_v37 = vrot.slane %v1419_v41, 1 }
 0x20b   :  { %v2689_v54 = vsel %vm2595_vm7, %v2568_v30, %v2688_v4  ;;  %v1873_v57 = vrot.slane %v1872_v16, 2  ;;  %v1396_v23 = vmax.f32 %v1394_v51, %v1395_v29  ;;  %v1426_v55 = vmax.f32 %v1424_v1, %v1425_v47 }
 0x20c   :  { %v2690_v21 = vsel %vm2597_vm8, %v2569_v26, %v2689_v54  ;;  %v1390_v60 = vrot.slane %v1389_v15, 2  ;;  %v850_v42 = vmax.f32 %v786_v38, 0.0  ;;  %v686_v52 = vmul.f32 %v3989_v7, %v3804_v6 }
 0x20d   :  { %v2691_v43 = vsel %vm2599_vm9, %v2570_v18, %v2690_v21  ;;  %v1397_v22 = vrot.slane %v1396_v23, 2  ;;  %v718_v31 = vmul.f32 %v3989_v7, %v3822_v35  ;;  %v1867_v40 = vmax.f32 %v1865_v2, %v1866_v62 }
 0x20e   :  { %v2719_v59 = vpack.c.b16 %v2691_v43, %v2691_v43  ;;  %v978_v61 = vcombine.high %v850_v42, %v850_v42  ;;  %v1835_v10 = vsel %vm1050_vm2, %v850_v42, -inf  ;;  %v1421_v63 = vmax.f32 %v1419_v41, %v1420_v37 }
 0x20f   :  { %v1836_v13 = vrot.slane %v1835_v10, 4  ;;  %v757_v9 = vadd.f32 %v3981_v24, %v686_v52  ;;  %v789_v39 = vadd.f32 %v3981_v24, %v718_v31  ;;  %v1398_v6 = vmax.f32 %v1396_v23, %v1397_v22 }
 0x210   :  { %2751 = vst.msk [vmem:[%s4212_s4 + $0x34] sm:$0xf] %vm1050_vm2, %v2719_v59  ;;  %v1842_v5 = vsel %vm1050_vm2, %v978_v61, -inf  ;;  %v684_v35 = vmul.f32 %v3989_v7, %v3824_v44  ;;  %v1391_v56 = vmax.f32 %v1389_v15, %v1390_v60  ;;  %v1427_v27 = vrot.slane %v1426_v55, 1 }
 0x211   :  { %v1837_v50 = vmax.f32 %v1835_v10, %v1836_v13  ;;  %v1843_v11 = vrot.slane %v1842_v5, 4  ;;  %v821_v1 = vmax.f32 %v757_v9, 0.0  ;;  %v1874_v32 = vmax.f32 %v1872_v16, %v1873_v57 }
 0x212   :  { %v853_v28 = vmax.f32 %v789_v39, 0.0  ;;  %v3007_v0 = vpack.c.bf16 %v1421_v63, %v1421_v63  ;;  %v1868_v3 = vrot.slane %v1867_v40, 1  ;;  %v1399_v2 = vrot.slane %v1398_v6, 1 }
 0x213   :  { %v949_v48 = vcombine.high %v821_v1, %v821_v1  ;;  %v1429_v49 = vsel %vm1050_vm2, %v821_v1, -inf  ;;  %v755_v19 = vadd.f32 %v3981_v24, %v684_v35  ;;  %v1392_v41 = vrot.slane %v1391_v56, 1 }
 0x214   :  { %v981_v58 = vcombine.high %v853_v28, %v853_v28  ;;  %v1838_v53 = vrot.slane %v1837_v50, 2  ;;  %v1844_v30 = vmax.f32 %v1842_v5, %v1843_v11  ;;  %v1430_v44 = vrot.slane %v1429_v49, 4 }
 0x215   :  { %v1428_v47 = vmax.f32 %v1426_v55, %v1427_v27  ;;  %v1875_v25 = vrot.slane %v1874_v32, 1  ;;  %v1436_v51 = vsel %vm1050_vm2, %v949_v48, -inf  ;;  %v1877_v16 = vsel %vm1050_vm2, %v853_v28, -inf }
 0x216   :  { %v1431_v26 = vmax.f32 %v1429_v49, %v1430_v44  ;;  %v1884_v18 = vsel %vm1050_vm2, %v981_v58, -inf  ;;  %v716_v46 = vmul.f32 %v3989_v7, %v3840_v36  ;;  %v1869_v29 = vmax.f32 %v1867_v40, %v1868_v3 }
 0x217   :  { %v1400_v4 = vmax.f32 %v1398_v6, %v1399_v2  ;;  %v1437_v62 = vrot.slane %v1436_v51, 4  ;;  %v819_v15 = vmax.f32 %v755_v19, 0.0  ;;  %v4091_v38 = vunpack.c.l.b16 %v3007_v0 }
 0x218   :  { %v1393_v54 = vmax.f32 %v1391_v56, %v1392_v41  ;;  %v1839_v37 = vmax.f32 %v1837_v50, %v1838_v53  ;;  %v1845_v57 = vrot.slane %v1844_v30, 2  ;;  %v1878_v21 = vrot.slane %v1877_v16, 4 }
 0x219   :  { %v1438_v23 = vmax.f32 %v1436_v51, %v1437_v62  ;;  %v1885_v55 = vrot.slane %v1884_v18, 4  ;;  %v947_v60 = vcombine.high %v819_v15, %v819_v15  ;;  %v4093_v42 = vmax.f32 %v1874_v32, %v1875_v25 }
 0x21a   :  { %v1432_v43 = vrot.slane %v1431_v26, 2  ;;  %v1401_v22 = vsel %vm1050_vm2, %v819_v15, -inf  ;;  %v787_v36 = vadd.f32 %v3981_v24, %v716_v46  ;;  %v3008_v52 = vpack.c.bf16 %v1428_v47, %v1428_v47 }
 0x21b   :  { %v3004_v31 = vpack.c.bf16 %v1400_v4, %v1400_v4  ;;  %v1439_v59 = vrot.slane %v1438_v23, 2  ;;  %v1402_v40 = vrot.slane %v1401_v22, 4  ;;  %v3071_v61 = vpack.c.bf16 %v1869_v29, %v1869_v29 }
 0x21c   :  { %v3003_v10 = vpack.c.bf16 %v1393_v54, %v1393_v54  ;;  %v1846_v63 = vmax.f32 %v1844_v30, %v1845_v57  ;;  %v1408_v13 = vsel %vm1050_vm2, %v947_v60, -inf  ;;  %v1840_v9 = vrot.slane %v1839_v37, 1 }
 0x21d   :  { %v1879_v39 = vmax.f32 %v1877_v16, %v1878_v21  ;;  %v1886_v6 = vmax.f32 %v1884_v18, %v1885_v55  ;;  %v1403_v5 = vmax.f32 %v1401_v22, %v1402_v40  ;;  %v3072_v35 = vpack.c.bf16 %v4093_v42, %v4093_v42 }
 0x21e   :  { %v1433_v56 = vmax.f32 %v1431_v26, %v1432_v43  ;;  %v1409_v50 = vrot.slane %v1408_v13, 4  ;;  %v851_v11 = vmax.f32 %v787_v36, 0.0  ;;  %v4100_v1 = vunpack.c.l.b16 %v3008_v52 }
 0x21f   :  { %v2508_v27 = vunpack.c.l.b16 %v3004_v31  ;;  %v1440_v32 = vmax.f32 %v1438_v23, %v1439_v59  ;;  %v1404_v28 = vrot.slane %v1403_v5, 2  ;;  %v2507_v0 = vunpack.c.l.b16 %v3003_v10 }
 0x220   :  { %v1847_v3 = vrot.slane %v1846_v63, 1  ;;  %v1410_v48 = vmax.f32 %v1408_v13, %v1409_v50  ;;  %v979_v2 = vcombine.high %v851_v11, %v851_v11  ;;  %v1841_v49 = vmax.f32 %v1839_v37, %v1840_v9 }
 0x221   :  { %v1880_v58 = vrot.slane %v1879_v39, 2  ;;  %v1887_v19 = vrot.slane %v1886_v6, 2  ;;  %v1405_v41 = vmax.f32 %v1403_v5, %v1404_v28  ;;  %v1434_v53 = vrot.slane %v1433_v56, 1 }
 0x222   :  { %v1411_v30 = vrot.slane %v1410_v48, 2  ;;  %v1849_v44 = vsel %vm1050_vm2, %v851_v11, -inf  ;;  %v1856_v47 = vsel %vm1050_vm2, %v979_v2, -inf  ;;  %v4104_v25 = vunpack.c.l.b16 %v3071_v61 }
 0x223   :  { %v2636_v51 = vsel %vm2587_vm3, %v2508_v27, %v2507_v0  ;;  %v1441_v26 = vrot.slane %v1440_v32, 1  ;;  %v1406_v16 = vrot.slane %v1405_v41, 1  ;;  %v1848_v18 = vmax.f32 %v1846_v63, %v1847_v3 }
 0x224   :  { %v1412_v46 = vmax.f32 %v1410_v48, %v1411_v30  ;;  %v1850_v29 = vrot.slane %v1849_v44, 4  ;;  %v1857_v4 = vrot.slane %v1856_v47, 4  ;;  %v3067_v62 = vpack.c.bf16 %v1841_v49, %v1841_v49 }
 0x225   :  { %v1881_v15 = vmax.f32 %v1879_v39, %v1880_v58  ;;  %v1888_v54 = vmax.f32 %v1886_v6, %v1887_v19  ;;  %v1407_v37 = vmax.f32 %v1405_v41, %v1406_v16  ;;  %v1435_v57 = vmax.f32 %v1433_v56, %v1434_v53 }
 0x226   :  { %v1413_v23 = vrot.slane %v1412_v46, 1  ;;  %v1851_v21 = vmax.f32 %v1849_v44, %v1850_v29  ;;  %v1858_v55 = vmax.f32 %v1856_v47, %v1857_v4  ;;  %v1442_v60 = vmax.f32 %v1440_v32, %v1441_v26 }
 0x227   :  { %v3005_v43 = vpack.c.bf16 %v1407_v37, %v1407_v37  ;;  %v689_v22 = vmul.f32 %v3989_v7, %v3860_v20  ;;  %v721_v36 = vmul.f32 %v3989_v7, %v3873_v12  ;;  %v687_v40 = vmul.f32 %v3989_v7, %v3882_v14 }
 0x228   :  { %v1414_v52 = vmax.f32 %v1412_v46, %v1413_v23  ;;  %v1852_v31 = vrot.slane %v1851_v21, 2  ;;  %v1859_v59 = vrot.slane %v1858_v55, 2  ;;  %v3068_v61 = vpack.c.bf16 %v1848_v18, %v1848_v18 }
 0x229   :  { %v1882_v10 = vrot.slane %v1881_v15, 1  ;;  %v1889_v63 = vrot.slane %v1888_v54, 1  ;;  %v2509_v13 = vunpack.c.l.b16 %v3005_v43  ;;  %v3009_v9 = vpack.c.bf16 %v1435_v57, %v1435_v57 }
 0x22a   :  { %v3006_v39 = vpack.c.bf16 %v1414_v52, %v1414_v52  ;;  %v1853_v6 = vmax.f32 %v1851_v21, %v1852_v31  ;;  %v1860_v5 = vmax.f32 %v1858_v55, %v1859_v59  ;;  %v3010_v56 = vpack.c.bf16 %v1442_v60, %v1442_v60 }
 0x22b   :  { %v2637_v20 = vsel %vm2589_vm4, %v2509_v13, %v2636_v51  ;;  %v760_v50 = vadd.f32 %v3981_v24, %v689_v22  ;;  %v792_v12 = vadd.f32 %v3981_v24, %v721_v36  ;;  %v758_v14 = vadd.f32 %v3981_v24, %v687_v40 }
 0x22c   :  { %v2510_v11 = vunpack.c.l.b16 %v3006_v39  ;;  %v1854_v27 = vrot.slane %v1853_v6, 1  ;;  %v1861_v32 = vrot.slane %v1860_v5, 1  ;;  %v2571_v28 = vunpack.c.l.b16 %v3067_v62 }
 0x22d   :  { %v2572_v0 = vunpack.c.l.b16 %v3068_v61  ;;  %v1883_v3 = vmax.f32 %v1881_v15, %v1882_v10  ;;  %v1890_v48 = vmax.f32 %v1888_v54, %v1889_v63  ;;  %v2513_v2 = vunpack.c.l.b16 %v3009_v9 }
 0x22e   :  { %v2638_v49 = vsel %vm2591_vm5, %v2510_v11, %v2637_v20  ;;  %v1855_v58 = vmax.f32 %v1853_v6, %v1854_v27  ;;  %v1862_v19 = vmax.f32 %v1860_v5, %v1861_v32  ;;  %v2514_v41 = vunpack.c.l.b16 %v3010_v56 }
 0x22f   :  { %v2639_v53 = vsel %vm2593_vm6, %v4091_v38, %v2638_v49  ;;  %v824_v30 = vmax.f32 %v760_v50, 0.0  ;;  %v856_v44 = vmax.f32 %v792_v12, 0.0  ;;  %v822_v16 = vmax.f32 %v758_v14, 0.0 }
 0x230   :  { %v2640_v47 = vsel %vm2595_vm7, %v4100_v1, %v2639_v53  ;;  %v3069_v51 = vpack.c.bf16 %v1855_v58, %v1855_v58  ;;  %v3070_v26 = vpack.c.bf16 %v1862_v19, %v1862_v19  ;;  %v2692_v18 = vsel %vm2587_vm3, %v2572_v0, %v2571_v28 }
 0x231   :  { %v3073_v46 = vpack.c.bf16 %v1883_v3, %v1883_v3  ;;  %v3074_v29 = vpack.c.bf16 %v1890_v48, %v1890_v48  ;;  %v2641_v4 = vsel %vm2597_vm8, %v2513_v2, %v2640_v47  ;;  %v2576_v62 = vunpack.c.l.b16 %v3072_v35 }
 0x232   :  { %v2642_v38 = vsel %vm2599_vm9, %v2514_v41, %v2641_v4  ;;  %v2573_v15 = vunpack.c.l.b16 %v3069_v51  ;;  %v2574_v54 = vunpack.c.l.b16 %v3070_v26  ;;  %v952_v57 = vcombine.high %v824_v30, %v824_v30 }
 0x233   :  { %v2712_v37 = vpack.c.b16 %v2642_v38, %v2642_v38  ;;  %v1471_v1 = vsel %vm1050_vm2, %v824_v30, -inf  ;;  %v719_v23 = vmul.f32 %v3989_v7, %v3902_v33  ;;  %v1919_v55 = vsel %vm1050_vm2, %v856_v44, -inf }
 0x234   :  { %v2693_v21 = vsel %vm2589_vm4, %v2573_v15, %v2692_v18  ;;  %v950_v60 = vcombine.high %v822_v16, %v822_v16  ;;  %v1443_v43 = vsel %vm1050_vm2, %v822_v16, -inf  ;;  %v2577_v42 = vunpack.c.l.b16 %v3073_v46 }
 0x235   :  { %v2578_v35 = vunpack.c.l.b16 %v3074_v29  ;;  %2744 = vst.msk [vmem:[%s4212_s4 + $0x18] sm:$0xf] %vm1050_vm2, %v2712_v37  ;;  %v2694_v22 = vsel %vm2591_vm5, %v2574_v54, %v2693_v21  ;;  %v984_v36 = vcombine.high %v856_v44, %v856_v44  ;;  %v1472_v52 = vrot.slane %v1471_v1, 4 }
 0x236   :  { %v2695_v33 = vsel %vm2593_vm6, %v4104_v25, %v2694_v22  ;;  %v1444_v31 = vrot.slane %v1443_v43, 4  ;;  %v1450_v59 = vsel %vm1050_vm2, %v950_v60, -inf  ;;  %v1478_v61 = vsel %vm1050_vm2, %v952_v57, -inf }
 0x237   :  { %v2696_v40 = vsel %vm2595_vm7, %v2576_v62, %v2695_v33  ;;  %v1920_v10 = vrot.slane %v1919_v55, 4  ;;  %v790_v63 = vadd.f32 %v3981_v24, %v719_v23  ;;  %v1451_v39 = vrot.slane %v1450_v59, 4 }
 0x238   :  { %v2697_v13 = vsel %vm2597_vm8, %v2577_v42, %v2696_v40  ;;  %v1445_v9 = vmax.f32 %v1443_v43, %v1444_v31  ;;  %v1926_v5 = vsel %vm1050_vm2, %v984_v36, -inf  ;;  %v1473_v56 = vmax.f32 %v1471_v1, %v1472_v52 }
 0x239   :  { %v2698_v6 = vsel %vm2599_vm9, %v2578_v35, %v2697_v13  ;;  %v1479_v20 = vrot.slane %v1478_v61, 4  ;;  %v1452_v50 = vmax.f32 %v1450_v59, %v1451_v39  ;;  %v1921_v12 = vmax.f32 %v1919_v55, %v1920_v10 }
 0x23a   :  { %v2720_v25 = vpack.c.b16 %v2698_v6, %v2698_v6  ;;  %v854_v11 = vmax.f32 %v790_v63, 0.0  ;;  %v1927_v27 = vrot.slane %v1926_v5, 4  ;;  %v1446_v32 = vrot.slane %v1445_v9, 2 }
 0x23b   :  { %v690_v14 = vmul.f32 %v3989_v7, %v3912_v34  ;;  %v722_v28 = vmul.f32 %v3989_v7, %v3926_v45  ;;  %v1453_v0 = vrot.slane %v1452_v50, 2  ;;  %v1474_v48 = vrot.slane %v1473_v56, 2 }
 0x23c   :  { %2752 = vst.msk [vmem:[%s4212_s4 + $0x38] sm:$0xf] %vm1050_vm2, %v2720_v25  ;;  %v982_v3 = vcombine.high %v854_v11, %v854_v11  ;;  %v1480_v2 = vmax.f32 %v1478_v61, %v1479_v20  ;;  %v688_v41 = vmul.f32 %v3989_v7, %v3929_v8  ;;  %v1922_v53 = vrot.slane %v1921_v12, 2 }
 0x23d   :  { %v761_v49 = vadd.f32 %v3981_v24, %v690_v14  ;;  %v793_v19 = vadd.f32 %v3981_v24, %v722_v28  ;;  %v1928_v30 = vmax.f32 %v1926_v5, %v1927_v27  ;;  %v1447_v44 = vmax.f32 %v1445_v9, %v1446_v32 }
 0x23e   :  { %v1898_v58 = vsel %vm1050_vm2, %v982_v3, -inf  ;;  %v1891_v34 = vsel %vm1050_vm2, %v854_v11, -inf  ;;  %v1454_v47 = vmax.f32 %v1452_v50, %v1453_v0  ;;  %v1475_v16 = vmax.f32 %v1473_v56, %v1474_v48 }
 0x23f   :  { %v1899_v45 = vrot.slane %v1898_v58, 4  ;;  %v825_v51 = vmax.f32 %v761_v49, 0.0  ;;  %v857_v26 = vmax.f32 %v793_v19, 0.0  ;;  %v1481_v18 = vrot.slane %v1480_v2, 2 }
 0x240   :  { %v1892_v46 = vrot.slane %v1891_v34, 4  ;;  %v759_v62 = vadd.f32 %v3981_v24, %v688_v41  ;;  %v1923_v38 = vmax.f32 %v1921_v12, %v1922_v53  ;;  %v1929_v15 = vrot.slane %v1928_v30, 2 }
 0x241   :  { %v953_v29 = vcombine.high %v825_v51, %v825_v51  ;;  %v1485_v4 = vsel %vm1050_vm2, %v825_v51, -inf  ;;  %v1448_v8 = vrot.slane %v1447_v44, 1  ;;  %v985_v54 = vcombine.high %v857_v26, %v857_v26 }
 0x242   :  { %v1455_v37 = vrot.slane %v1454_v47, 1  ;;  %v1900_v57 = vmax.f32 %v1898_v58, %v1899_v45  ;;  %v1486_v1 = vrot.slane %v1485_v4, 4  ;;  %v1476_v21 = vrot.slane %v1475_v16, 1 }
 0x243   :  { %v1492_v23 = vsel %vm1050_vm2, %v953_v29, -inf  ;;  %v1482_v55 = vmax.f32 %v1480_v2, %v1481_v18  ;;  %v720_v43 = vmul.f32 %v3989_v7, %v3938_v17  ;;  %v1893_v42 = vmax.f32 %v1891_v34, %v1892_v46 }
 0x244   :  { %v1493_v60 = vrot.slane %v1492_v23, 4  ;;  %v1487_v35 = vmax.f32 %v1485_v4, %v1486_v1  ;;  %v1933_v22 = vsel %vm1050_vm2, %v857_v26, -inf  ;;  %v823_v36 = vmax.f32 %v759_v62, 0.0 }
 0x245   :  { %v1924_v33 = vrot.slane %v1923_v38, 1  ;;  %v4168_v52 = vmax.f32 %v1928_v30, %v1929_v15  ;;  %v1940_v59 = vsel %vm1050_vm2, %v985_v54, -inf  ;;  %v1449_v40 = vmax.f32 %v1447_v44, %v1448_v8 }
 0x246   :  { %v1494_v31 = vmax.f32 %v1492_v23, %v1493_v60  ;;  %v1456_v61 = vmax.f32 %v1454_v47, %v1455_v37  ;;  %v1901_v10 = vrot.slane %v1900_v57, 2  ;;  %v951_v63 = vcombine.high %v823_v36, %v823_v36 }
 0x247   :  { %v4171_v13 = vmax.f32 %v1475_v16, %v1476_v21  ;;  %v1934_v9 = vrot.slane %v1933_v22, 4  ;;  %v1457_v17 = vsel %vm1050_vm2, %v823_v36, -inf  ;;  %v791_v7 = vadd.f32 %v3981_v24, %v720_v43 }
 0x248   :  { %v1894_v39 = vrot.slane %v1893_v42, 2  ;;  %v1488_v6 = vrot.slane %v1487_v35, 2  ;;  %v1941_v5 = vrot.slane %v1940_v59, 4  ;;  %v1458_v25 = vrot.slane %v1457_v17, 4 }
 0x249   :  { %v1483_v56 = vrot.slane %v1482_v55, 1  ;;  %v4175_v20 = vmax.f32 %v1923_v38, %v1924_v33  ;;  %v1495_v50 = vrot.slane %v1494_v31, 2  ;;  %v1464_v12 = vsel %vm1050_vm2, %v951_v63, -inf }
 0x24a   :  { %v3011_v11 = vpack.c.bf16 %v1449_v40, %v1449_v40  ;;  %v3012_v27 = vpack.c.bf16 %v1456_v61, %v1456_v61  ;;  %v1902_v32 = vmax.f32 %v1900_v57, %v1901_v10  ;;  %v1459_v14 = vmax.f32 %v1457_v17, %v1458_v25 }
 0x24b   :  { %v1931_v28 = vrot.slane %v4168_v52, 1  ;;  %v1935_v0 = vmax.f32 %v1933_v22, %v1934_v9  ;;  %v1465_v3 = vrot.slane %v1464_v12, 4  ;;  %v855_v48 = vmax.f32 %v791_v7, 0.0 }
 0x24c   :  { %v1895_v24 = vmax.f32 %v1893_v42, %v1894_v39  ;;  %v1489_v2 = vmax.f32 %v1487_v35, %v1488_v6  ;;  %v1942_v49 = vmax.f32 %v1940_v59, %v1941_v5  ;;  %v1460_v58 = vrot.slane %v1459_v14, 2 }
 0x24d   :  { %v3015_v19 = vpack.c.bf16 %v4171_v13, %v4171_v13  ;;  %v1496_v41 = vmax.f32 %v1494_v31, %v1495_v50  ;;  %v1466_v53 = vmax.f32 %v1464_v12, %v1465_v3  ;;  %v983_v30 = vcombine.high %v855_v48, %v855_v48 }
 0x24e   :  { %v2515_v44 = vunpack.c.l.b16 %v3011_v11  ;;  %v2516_v34 = vunpack.c.l.b16 %v3012_v27  ;;  %v1903_v47 = vrot.slane %v1902_v32, 1  ;;  %v1461_v45 = vmax.f32 %v1459_v14, %v1460_v58 }
 0x24f   :  { %v1936_v51 = vrot.slane %v1935_v0, 2  ;;  %v1467_v26 = vrot.slane %v1466_v53, 2  ;;  %v1905_v16 = vsel %vm1050_vm2, %v855_v48, -inf  ;;  %v1912_v18 = vsel %vm1050_vm2, %v983_v30, -inf }
 0x250   :  { %v1896_v46 = vrot.slane %v1895_v24, 1  ;;  %v1490_v29 = vrot.slane %v1489_v2, 1  ;;  %v1943_v4 = vrot.slane %v1942_v49, 2  ;;  %v1462_v62 = vrot.slane %v1461_v45, 1 }
 0x251   :  { %v1497_v38 = vrot.slane %v1496_v41, 1  ;;  %v1468_v15 = vmax.f32 %v1466_v53, %v1467_v26  ;;  %v1906_v8 = vrot.slane %v1905_v16, 4  ;;  %v1913_v54 = vrot.slane %v1912_v18, 4 }
 0x252   :  { %v1484_v37 = vmax.f32 %v1482_v55, %v1483_v56  ;;  %v2643_v57 = vsel %vm2587_vm3, %v2516_v34, %v2515_v44  ;;  %v1904_v1 = vmax.f32 %v1902_v32, %v1903_v47  ;;  %v1463_v23 = vmax.f32 %v1461_v45, %v1462_v62 }
 0x253   :  { %v1937_v21 = vmax.f32 %v1935_v0, %v1936_v51  ;;  %v1469_v60 = vrot.slane %v1468_v15, 1  ;;  %v1907_v43 = vmax.f32 %v1905_v16, %v1906_v8  ;;  %v1914_v42 = vmax.f32 %v1912_v18, %v1913_v54 }
 0x254   :  { %v1897_v35 = vmax.f32 %v1895_v24, %v1896_v46  ;;  %v1491_v22 = vmax.f32 %v1489_v2, %v1490_v29  ;;  %v1944_v36 = vmax.f32 %v1942_v49, %v1943_v4  ;;  %v3013_v33 = vpack.c.bf16 %v1463_v23, %v1463_v23 }
 0x255   :  { %v1498_v31 = vmax.f32 %v1496_v41, %v1497_v38  ;;  %v1470_v59 = vmax.f32 %v1468_v15, %v1469_v60  ;;  %v1908_v40 = vrot.slane %v1907_v43, 2  ;;  %v1915_v61 = vrot.slane %v1914_v42, 2 }
 0x256   :  { %v3016_v10 = vpack.c.bf16 %v1484_v37, %v1484_v37  ;;  %v1932_v63 = vmax.f32 %v4168_v52, %v1931_v28  ;;  %v3076_v55 = vpack.c.bf16 %v1904_v1, %v1904_v1  ;;  %v2517_v13 = vunpack.c.l.b16 %v3013_v33 }
 0x257   :  { %v1938_v9 = vrot.slane %v1937_v21, 1  ;;  %v3014_v17 = vpack.c.bf16 %v1470_v59, %v1470_v59  ;;  %v1909_v7 = vmax.f32 %v1907_v43, %v1908_v40  ;;  %v1916_v39 = vmax.f32 %v1914_v42, %v1915_v61 }
 0x258   :  { %v3075_v6 = vpack.c.bf16 %v1897_v35, %v1897_v35  ;;  %v3017_v5 = vpack.c.bf16 %v1491_v22, %v1491_v22  ;;  %v1945_v25 = vrot.slane %v1944_v36, 1  ;;  %v2644_v56 = vsel %vm2589_vm4, %v2517_v13, %v2643_v57 }
 0x259   :  { %v3018_v50 = vpack.c.bf16 %v1498_v31, %v1498_v31  ;;  %v2518_v12 = vunpack.c.l.b16 %v3014_v17  ;;  %v1910_v11 = vrot.slane %v1909_v7, 1  ;;  %v1917_v27 = vrot.slane %v1916_v39, 1 }
 0x25a   :  { %v2519_v32 = vunpack.c.l.b16 %v3015_v19  ;;  %v2520_v14 = vunpack.c.l.b16 %v3016_v10  ;;  %v3079_v52 = vpack.c.bf16 %v4175_v20, %v4175_v20  ;;  %v2580_v28 = vunpack.c.l.b16 %v3076_v55 }
 0x25b   :  { %v1939_v0 = vmax.f32 %v1937_v21, %v1938_v9  ;;  %v2645_v3 = vsel %vm2591_vm5, %v2518_v12, %v2644_v56  ;;  %v1911_v48 = vmax.f32 %v1909_v7, %v1910_v11  ;;  %v1918_v24 = vmax.f32 %v1916_v39, %v1917_v27 }
 0x25c   :  { %v2579_v2 = vunpack.c.l.b16 %v3075_v6  ;;  %v2521_v49 = vunpack.c.l.b16 %v3017_v5  ;;  %v1946_v58 = vmax.f32 %v1944_v36, %v1945_v25  ;;  %v2646_v41 = vsel %vm2593_vm6, %v2519_v32, %v2645_v3 }
 0x25d   :  { %v2522_v53 = vunpack.c.l.b16 %v3018_v50  ;;  %v2647_v30 = vsel %vm2595_vm7, %v2520_v14, %v2646_v41  ;;  %v3077_v44 = vpack.c.bf16 %v1911_v48, %v1911_v48  ;;  %v3078_v19 = vpack.c.bf16 %v1918_v24, %v1918_v24 }
 0x25e   :  { %v3080_v34 = vpack.c.bf16 %v1932_v63, %v1932_v63  ;;  %v2699_v47 = vsel %vm2587_vm3, %v2580_v28, %v2579_v2  ;;  %v2648_v20 = vsel %vm2597_vm8, %v2521_v49, %v2647_v30  ;;  %v3081_v45 = vpack.c.bf16 %v1939_v0, %v1939_v0 }
 0x25f   :  { %v2649_v51 = vsel %vm2599_vm9, %v2522_v53, %v2648_v20  ;;  %v2581_v26 = vunpack.c.l.b16 %v3077_v44  ;;  %v2582_v16 = vunpack.c.l.b16 %v3078_v19  ;;  %v3082_v18 = vpack.c.bf16 %v1946_v58, %v1946_v58 }
 0x260   :  { %v2713_v46 = vpack.c.b16 %v2649_v51, %v2649_v51  ;;  %v2583_v29 = vunpack.c.l.b16 %v3079_v52  ;;  %v2584_v62 = vunpack.c.l.b16 %v3080_v34  ;;  %v2585_v15 = vunpack.c.l.b16 %v3081_v45 }
 0x261   :  { %v2700_v4 = vsel %vm2589_vm4, %v2581_v26, %v2699_v47  ;;  %v2586_v54 = vunpack.c.l.b16 %v3082_v18 }
 0x262   :  { %2745 = vst.msk [vmem:[%s4212_s4 + $0x1c] sm:$0xf] %vm1050_vm2, %v2713_v46  ;;  %v2701_v38 = vsel %vm2591_vm5, %v2582_v16, %v2700_v4 }
 0x263   :  { %v2702_v8 = vsel %vm2593_vm6, %v2583_v29, %v2701_v38 }
 0x264   :  { %v2703_v37 = vsel %vm2595_vm7, %v2584_v62, %v2702_v8 }
 0x265   :  { %v2704_v57 = vsel %vm2597_vm8, %v2585_v15, %v2703_v37 }
 0x266   :  { %v2705_v1 = vsel %vm2599_vm9, %v2586_v54, %v2704_v57 }
 0x267   :  { %v2721_v23 = vpack.c.b16 %v2705_v1, %v2705_v1 }
 0x269   :  { %2753 = vst.msk [vmem:[%s4212_s4 + $0x3c] sm:$0xf] %vm1050_vm2, %v2721_v23 }

</bundles_post_ra>
